<compile_context>
chip_gen: v7x
topology: tpu7x:2x2x1
jax: 0.10.0
libtpu: 0.0.40
codegen_flags: <defaults>
</compile_context>

<pallas_src>
import math
import functools

import numpy as np
import jax
import jax.numpy as jnp
from jax.experimental import pallas as pl
from jax.experimental.pallas import tpu as pltpu

# MXU operand / attention-internal dtype (accumulation is always f32).
# Set to jnp.float32 for an exact f32 validation path.
MXU_DTYPE = jnp.bfloat16

_VMEM_DEFAULT = 32 * 1024 * 1024


def _grid_params(vmem_est=0):
    kwargs = dict(dimension_semantics=("parallel",))
    if vmem_est > _VMEM_DEFAULT:
        # TODO(synk): size per generation (v7x: 64 MiB physical, v5e/v6e: 128 MiB).
        kwargs["vmem_limit_bytes"] = int(min(2 * vmem_est, 64 * 1024 * 1024))
    return pltpu.CompilerParams(**kwargs)


def _pick_tm(M):
    """Row tile for the M=B*L tiled matmul kernels (double-buffered by BlockSpec)."""
    # TODO(synk): sweep per generation (v7x / v5e scoped VMEM favours ~256 rows).
    return M if M <= 1024 else 512


# ----------------------------------------------------------------------------- #
# Pallas kernels
# ----------------------------------------------------------------------------- #
def _linear_kernel(x_ref, w_ref, b_ref, o_ref):
    """y = x @ w + b for one (tm, Din) row tile.  w: (Din, Dout) bf16, b: (1, Dout) f32."""
    y = jnp.dot(x_ref[...].astype(MXU_DTYPE), w_ref[...],
                preferred_element_type=jnp.float32)
    o_ref[...] = (y + b_ref[...]).astype(o_ref.dtype)


def _qkv_kernel(x_ref, wq_ref, bq_ref, wk_ref, bk_ref, wv_ref, bv_ref,
                q_ref, k_ref, v_ref):
    """Fused Q/K/V projection: one x read, three matmuls, three separate outputs."""
    x = x_ref[...].astype(MXU_DTYPE)
    q_ref[...] = (jnp.dot(x, wq_ref[...], preferred_element_type=jnp.float32)
                  + bq_ref[...]).astype(q_ref.dtype)
    k_ref[...] = (jnp.dot(x, wk_ref[...], preferred_element_type=jnp.float32)
                  + bk_ref[...]).astype(k_ref.dtype)
    v_ref[...] = (jnp.dot(x, wv_ref[...], preferred_element_type=jnp.float32)
                  + bv_ref[...]).astype(v_ref.dtype)


def _kv_kernel(x_ref, wk_ref, bk_ref, wv_ref, bv_ref, k_ref, v_ref):
    """Fused K/V projection for cross attention."""
    x = x_ref[...].astype(MXU_DTYPE)
    k_ref[...] = (jnp.dot(x, wk_ref[...], preferred_element_type=jnp.float32)
                  + bk_ref[...]).astype(k_ref.dtype)
    v_ref[...] = (jnp.dot(x, wv_ref[...], preferred_element_type=jnp.float32)
                  + bv_ref[...]).astype(v_ref.dtype)


def _ffn_kernel(x_ref, w1_ref, w2_ref, o_ref, *, act):
    """Fused FFN: y = act(x @ w1) @ w2 (conv1d k=1, bias=False in Autoformer)."""
    h = jnp.dot(x_ref[...].astype(MXU_DTYPE), w1_ref[...],
                preferred_element_type=jnp.float32)
    if act == "relu":
        h = jnp.maximum(h, 0.0)
    else:
        h = jax.nn.gelu(h, approximate=False)
    o_ref[...] = jnp.dot(h.astype(MXU_DTYPE), w2_ref[...],
                         preferred_element_type=jnp.float32).astype(o_ref.dtype)


def _decomp_kernel(x_ref, a_ref, res_ref, trend_ref):
    """series_decomp: trend = A @ x (moving-average matrix, f32), res = x - trend."""
    x = x_ref[0]
    trend = jnp.dot(a_ref[...], x, preferred_element_type=jnp.float32)
    trend_ref[0] = trend
    res_ref[0] = x - trend


def _add_decomp_kernel(x_ref, y_ref, a_ref, res_ref, trend_ref):
    """Fused residual add + series_decomp (res and trend outputs)."""
    s = x_ref[0] + y_ref[0]
    trend = jnp.dot(a_ref[...], s, preferred_element_type=jnp.float32)
    trend_ref[0] = trend
    res_ref[0] = s - trend


def _add_decomp_res_kernel(x_ref, y_ref, a_ref, res_ref):
    """Fused residual add + series_decomp, trend discarded (encoder path)."""
    s = x_ref[0] + y_ref[0]
    trend = jnp.dot(a_ref[...], s, preferred_element_type=jnp.float32)
    res_ref[0] = s - trend


def _my_layernorm_kernel(x_ref, g_ref, b_ref, o_ref):
    """my_Layernorm: LayerNorm over channels then subtract mean over time."""
    x = x_ref[0]
    mu = jnp.mean(x, axis=-1, keepdims=True)
    xc = x - mu
    var = jnp.mean(xc * xc, axis=-1, keepdims=True)
    xhat = xc * jax.lax.rsqrt(var + 1e-5) * g_ref[...] + b_ref[...]
    o_ref[0] = xhat - jnp.mean(xhat, axis=0, keepdims=True)


def _autocorr_kernel(q_ref, k_ref, v_ref, fc_ref, fs_ref, o_ref, *, top_k, inv_norm):
    """AutoCorrelation (inference time-delay aggregation) for one batch element.

    q, k, v : (L, D) channel-last, MXU_DTYPE;   D = n_heads * head_dim = d_model.
    corr = irfft(rfft(q) * conj(rfft(k))) averaged over channels, computed with
    dense DFT matmuls (exactly the reference algorithm; no (L,L) K.Q^T and no
    O(nbits*L^3) diagonal-alignment matmuls, no big G constant).
    Top-k delays over corr, softmax weights, aggregate shifted values:
        out[t, c] = sum_i p_i * v[(t + delay_i) % L, c].
    """
    q = q_ref[0]
    k = k_ref[0]
    v = v_ref[0]
    L, D = q.shape

    fc = fc_ref[...]                       # (L, L) f32, cos(2*pi*f*t/L)
    fs = fs_ref[...]                       # (L, L) f32, sin(2*pi*f*t/L)
    fcm = fc.astype(MXU_DTYPE)
    fsm = fs.astype(MXU_DTYPE)

    # forward DFT (real/imag) of q and k along time: 4 bf16 MXU matmuls, f32 acc.
    qr = jnp.dot(fcm, q, preferred_element_type=jnp.float32)       # (L, D)
    qi = -jnp.dot(fsm, q, preferred_element_type=jnp.float32)
    kr = jnp.dot(fcm, k, preferred_element_type=jnp.float32)
    ki = -jnp.dot(fsm, k, preferred_element_type=jnp.float32)

    # Z[f] = sum_c Qf[f,c] * conj(Kf[f,c])   (VPU elementwise + lane reduction)
    zr = jnp.sum(qr * kr + qi * ki, axis=1, keepdims=True)         # (L, 1)
    zi = jnp.sum(qi * kr - qr * ki, axis=1, keepdims=True)

    # inverse DFT (real part) + 1/L and 1/D (channel mean) normalization -> corr
    corr = (jnp.dot(fc, zr, preferred_element_type=jnp.float32)
            - jnp.dot(fs, zi, preferred_element_type=jnp.float32)) * inv_norm  # (L,1)

    # iterative top-k (values descending, ties -> lowest index), exact f32
    ridx = jax.lax.broadcasted_iota(jnp.int32, (L, 1), 0)
    work = corr
    weights, delays = [], []
    for _ in range(top_k):
        wmax = jnp.max(work)
        amax = jnp.min(jnp.where(work == wmax, ridx, L))
        weights.append(wmax)
        delays.append(amax)
        work = jnp.where(ridx == amax, -1e30, work)

    # softmax over the top-k correlation weights (f32 scalars)
    exps = [jnp.exp(w - weights[0]) for w in weights]
    denom = exps[0]
    for e in exps[1:]:
        denom = denom + e
    probs = [e / denom for e in exps]

    # aggregation matrix W[t, s] = sum_i p_i * [(s - t) mod L == delay_i]
    # so that out[t, c] = sum_s W[t, s] * v[s, c] = sum_i p_i * v[(t+delay_i)%L, c]
    t_row = jax.lax.broadcasted_iota(jnp.int32, (L, L), 0)
    s_col = jax.lax.broadcasted_iota(jnp.int32, (L, L), 1)
    sd = jnp.mod(s_col - t_row + L, L)
    W = jnp.zeros((L, L), jnp.float32)
    for i in range(top_k):
        W = W + jnp.where(sd == delays[i], probs[i], 0.0)
    # TODO(synk): replace W @ v with top_k weighted pltpu.roll(v, delay_i, axis=0)
    # once dynamic sublane rotates at non-(8,128)-aligned shapes lower cleanly.
    out = jnp.dot(W.astype(v.dtype), v, preferred_element_type=jnp.float32)
    o_ref[0] = out.astype(o_ref.dtype)


# ----------------------------------------------------------------------------- #
# Host-precomputed constants (moving-average matrix, DFT matrices)
# ----------------------------------------------------------------------------- #
def make_consts(L, kernel_size):
    # moving-average matrix matching moving_avg (replicate pad, stride 1)
    p = (kernel_size - 1) // 2
    t = np.arange(L)[:, None]
    j = np.arange(kernel_size)[None, :]
    src = np.clip(t + j - p, 0, L - 1)
    A = np.zeros((L, L), np.float32)
    np.add.at(A, (np.broadcast_to(t, src.shape), src), 1.0 / kernel_size)

    # symmetric DFT matrices for the in-kernel circular correlation
    f = np.arange(L)[:, None].astype(np.float64)
    tt = np.arange(L)[None, :].astype(np.float64)
    ang = 2.0 * np.pi * np.mod(f * tt, L) / L
    Fc = np.cos(ang).astype(np.float32)
    Fs = np.sin(ang).astype(np.float32)
    return dict(A=jnp.asarray(A), Fc=jnp.asarray(Fc), Fs=jnp.asarray(Fs))


# ----------------------------------------------------------------------------- #
# Wrappers around pallas_call
# ----------------------------------------------------------------------------- #
def linear(x, w, b=None, out_dtype=jnp.float32):
    """y = x @ w (+ b), tiled over rows M = prod(leading dims)."""
    din = x.shape[-1]
    dout = w.shape[-1]
    lead = x.shape[:-1]
    M = int(np.prod(lead))
    x2 = x.reshape(M, din)
    b2 = (jnp.zeros((1, dout), jnp.float32) if b is None
          else b.reshape(1, dout).astype(jnp.float32))
    tm = _pick_tm(M)
    y = pl.pallas_call(
        _linear_kernel,
        out_shape=jax.ShapeDtypeStruct((M, dout), out_dtype),
        grid=(pl.cdiv(M, tm),),
        in_specs=[pl.BlockSpec((tm, din), lambda i: (i, 0)),
                  pl.BlockSpec((din, dout), lambda i: (0, 0)),
                  pl.BlockSpec((1, dout), lambda i: (0, 0))],
        out_specs=pl.BlockSpec((tm, dout), lambda i: (i, 0)),
        compiler_params=_grid_params(),
    )(x2, w.astype(MXU_DTYPE), b2)
    return y.reshape(lead + (dout,))


def qkv_project(x, p):
    """Fused Q/K/V projection; returns three separate MXU_DTYPE tensors."""
    lead = x.shape[:-1]
    din = x.shape[-1]
    d = p["w_q"].shape[-1]
    M = int(np.prod(lead))
    tm = _pick_tm(M)
    xspec = pl.BlockSpec((tm, din), lambda i: (i, 0))
    wspec = pl.BlockSpec((din, d), lambda i: (0, 0))
    bspec = pl.BlockSpec((1, d), lambda i: (0, 0))
    ospec = pl.BlockSpec((tm, d), lambda i: (i, 0))
    q, k, v = pl.pallas_call(
        _qkv_kernel,
        out_shape=tuple(jax.ShapeDtypeStruct((M, d), MXU_DTYPE) for _ in range(3)),
        grid=(pl.cdiv(M, tm),),
        in_specs=[xspec, wspec, bspec, wspec, bspec, wspec, bspec],
        out_specs=(ospec, ospec, ospec),
        compiler_params=_grid_params(),
    )(x.reshape(M, din),
      p["w_q"].astype(MXU_DTYPE), p["b_q"].reshape(1, d).astype(jnp.float32),
      p["w_k"].astype(MXU_DTYPE), p["b_k"].reshape(1, d).astype(jnp.float32),
      p["w_v"].astype(MXU_DTYPE), p["b_v"].reshape(1, d).astype(jnp.float32))
    return (q.reshape(lead + (d,)), k.reshape(lead + (d,)), v.reshape(lead + (d,)))


def kv_project(x, p):
    """Fused K/V projection for cross attention."""
    lead = x.shape[:-1]
    din = x.shape[-1]
    d = p["w_k"].shape[-1]
    M = int(np.prod(lead))
    tm = _pick_tm(M)
    xspec = pl.BlockSpec((tm, din), lambda i: (i, 0))
    wspec = pl.BlockSpec((din, d), lambda i: (0, 0))
    bspec = pl.BlockSpec((1, d), lambda i: (0, 0))
    ospec = pl.BlockSpec((tm, d), lambda i: (i, 0))
    k, v = pl.pallas_call(
        _kv_kernel,
        out_shape=tuple(jax.ShapeDtypeStruct((M, d), MXU_DTYPE) for _ in range(2)),
        grid=(pl.cdiv(M, tm),),
        in_specs=[xspec, wspec, bspec, wspec, bspec],
        out_specs=(ospec, ospec),
        compiler_params=_grid_params(),
    )(x.reshape(M, din),
      p["w_k"].astype(MXU_DTYPE), p["b_k"].reshape(1, d).astype(jnp.float32),
      p["w_v"].astype(MXU_DTYPE), p["b_v"].reshape(1, d).astype(jnp.float32))
    return k.reshape(lead + (d,)), v.reshape(lead + (d,))


def ffn(x, w1, w2, act):
    B, L, D = x.shape
    dff = w1.shape[-1]
    M = B * L
    tm = _pick_tm(M)
    isz = jnp.dtype(MXU_DTYPE).itemsize
    est = 2 * (tm * D * 4) * 2 + (D * dff + dff * D) * isz + tm * dff * 4
    y = pl.pallas_call(
        functools.partial(_ffn_kernel, act=act),
        out_shape=jax.ShapeDtypeStruct((M, D), jnp.float32),
        grid=(pl.cdiv(M, tm),),
        in_specs=[pl.BlockSpec((tm, D), lambda i: (i, 0)),
                  pl.BlockSpec((D, dff), lambda i: (0, 0)),
                  pl.BlockSpec((dff, D), lambda i: (0, 0))],
        out_specs=pl.BlockSpec((tm, D), lambda i: (i, 0)),
        compiler_params=_grid_params(est),
    )(x.reshape(M, D), w1.astype(MXU_DTYPE), w2.astype(MXU_DTYPE))
    return y.reshape(B, L, D)


def series_decomp(x, A):
    B, L, C = x.shape
    res, trend = pl.pallas_call(
        _decomp_kernel,
        out_shape=(jax.ShapeDtypeStruct((B, L, C), jnp.float32),
                   jax.ShapeDtypeStruct((B, L, C), jnp.float32)),
        grid=(B,),
        in_specs=[pl.BlockSpec((1, L, C), lambda b: (b, 0, 0)),
                  pl.BlockSpec((L, L), lambda b: (0, 0))],
        out_specs=(pl.BlockSpec((1, L, C), lambda b: (b, 0, 0)),
                   pl.BlockSpec((1, L, C), lambda b: (b, 0, 0))),
        compiler_params=_grid_params(),
    )(x.astype(jnp.float32), A)
    return res, trend


def add_decomp(x, y, A):
    """decomp(x + y) -> (res, trend)."""
    B, L, C = x.shape
    res, trend = pl.pallas_call(
        _add_decomp_kernel,
        out_shape=(jax.ShapeDtypeStruct((B, L, C), jnp.float32),
                   jax.ShapeDtypeStruct((B, L, C), jnp.float32)),
        grid=(B,),
        in_specs=[pl.BlockSpec((1, L, C), lambda b: (b, 0, 0)),
                  pl.BlockSpec((1, L, C), lambda b: (b, 0, 0)),
                  pl.BlockSpec((L, L), lambda b: (0, 0))],
        out_specs=(pl.BlockSpec((1, L, C), lambda b: (b, 0, 0)),
                   pl.BlockSpec((1, L, C), lambda b: (b, 0, 0))),
        compiler_params=_grid_params(),
    )(x.astype(jnp.float32), y.astype(jnp.float32), A)
    return res, trend


def add_decomp_res(x, y, A):
    """decomp(x + y) -> res only (trend never written back to HBM)."""
    B, L, C = x.shape
    return pl.pallas_call(
        _add_decomp_res_kernel,
        out_shape=jax.ShapeDtypeStruct((B, L, C), jnp.float32),
        grid=(B,),
        in_specs=[pl.BlockSpec((1, L, C), lambda b: (b, 0, 0)),
                  pl.BlockSpec((1, L, C), lambda b: (b, 0, 0)),
                  pl.BlockSpec((L, L), lambda b: (0, 0))],
        out_specs=pl.BlockSpec((1, L, C), lambda b: (b, 0, 0)),
        compiler_params=_grid_params(),
    )(x.astype(jnp.float32), y.astype(jnp.float32), A)


def my_layernorm(x, gamma, beta):
    B, L, D = x.shape
    return pl.pallas_call(
        _my_layernorm_kernel,
        out_shape=jax.ShapeDtypeStruct((B, L, D), jnp.float32),
        grid=(B,),
        in_specs=[pl.BlockSpec((1, L, D), lambda b: (b, 0, 0)),
                  pl.BlockSpec((1, D), lambda b: (0, 0)),
                  pl.BlockSpec((1, D), lambda b: (0, 0))],
        out_specs=pl.BlockSpec((1, L, D), lambda b: (b, 0, 0)),
        compiler_params=_grid_params(),
    )(x.astype(jnp.float32), gamma.reshape(1, D), beta.reshape(1, D))


def auto_correlation(q, k, v, consts, factor):
    """q: (B, L, D), k/v: (B, S, D) -> (B, L, D), channel-last, MXU_DTYPE io."""
    q = q.astype(MXU_DTYPE)
    k = k.astype(MXU_DTYPE)
    v = v.astype(MXU_DTYPE)
    B, L, D = q.shape
    S = k.shape[1]
    if L > S:
        pad = jnp.zeros((B, L - S, D), k.dtype)
        k = jnp.concatenate([k, pad], axis=1)
        v = jnp.concatenate([v, pad], axis=1)
    else:
        k = k[:, :L, :]
        v = v[:, :L, :]
    # guard for degenerate tiny L (PyTorch would take top-0); documented deviation.
    top_k = max(1, int(factor * math.log(L)))
    isz = jnp.dtype(MXU_DTYPE).itemsize
    est = (4 * L * D * isz * 2        # double-buffered q/k/v/out blocks
           + 2 * L * L * 4 * 2        # Fc / Fs
           + 4 * L * D * 4            # DFT intermediates
           + 3 * L * L * 4)           # W / index scratch
    return pl.pallas_call(
        functools.partial(_autocorr_kernel, top_k=top_k, inv_norm=1.0 / (L * D)),
        out_shape=jax.ShapeDtypeStruct((B, L, D), MXU_DTYPE),
        grid=(B,),
        in_specs=[pl.BlockSpec((1, L, D), lambda b: (b, 0, 0)),
                  pl.BlockSpec((1, L, D), lambda b: (b, 0, 0)),
                  pl.BlockSpec((1, L, D), lambda b: (b, 0, 0)),
                  pl.BlockSpec((L, L), lambda b: (0, 0)),
                  pl.BlockSpec((L, L), lambda b: (0, 0))],
        out_specs=pl.BlockSpec((1, L, D), lambda b: (b, 0, 0)),
        compiler_params=_grid_params(est),
    )(q, k, v, consts["Fc"], consts["Fs"])


def data_embedding(p, x, x_mark):
    """DataEmbedding_wo_pos: circular Conv1d(k=3) token emb + timeF linear.

    The +-1 circular time shifts are done with jnp.roll in XLA on the small raw
    input and folded with x_mark into one stacked matmul (host-stacked weight
    (3C+Mk, D)), which reuses the tiled linear kernel.  Dropout is identity.
    """
    xp = jnp.roll(x, 1, axis=1)      # x[t-1]
    xn = jnp.roll(x, -1, axis=1)     # x[t+1]
    xin = jnp.concatenate([xp, x, xn, x_mark], axis=-1)
    return linear(xin, p["w_emb"], None, out_dtype=jnp.float32)


def trend_projection(x, w_stack):
    """Conv1d(d_model -> c_out, k=3, circular, bias=False) on the trend path."""
    xp = jnp.roll(x, 1, axis=1)
    xn = jnp.roll(x, -1, axis=1)
    xin = jnp.concatenate([xp, x, xn], axis=-1)
    # TODO(synk): c_out-wide output -> masked vst; pad/fold for lane-dense stores.
    return linear(xin, w_stack, None, out_dtype=jnp.float32)


# ----------------------------------------------------------------------------- #
# Model building blocks (glue around the kernels)
# ----------------------------------------------------------------------------- #
def self_attention(p, x, consts, factor):
    q, k, v = qkv_project(x, p)
    out = auto_correlation(q, k, v, consts, factor)
    return linear(out, p["w_o"], p["b_o"], out_dtype=jnp.float32)


def cross_attention(p, x, cross, consts, factor):
    q = linear(x, p["w_q"], p["b_q"], out_dtype=MXU_DTYPE)
    k, v = kv_project(cross, p)
    out = auto_correlation(q, k, v, consts, factor)
    return linear(out, p["w_o"], p["b_o"], out_dtype=jnp.float32)


def encoder_layer(p, x, consts, factor, act):
    new_x = self_attention(p["attn"], x, consts, factor)
    x = add_decomp_res(x, new_x, consts["A"])          # trend discarded -> not stored
    y = ffn(x, p["w_ff1"], p["w_ff2"], act)
    x = add_decomp_res(x, y, consts["A"])
    return x


def decoder_layer(p, x, cross, consts, factor, act):
    attn_out = self_attention(p["self_attn"], x, consts, factor)
    x, trend1 = add_decomp(x, attn_out, consts["A"])
    cross_out = cross_attention(p["cross_attn"], x, cross, consts, factor)
    x, trend2 = add_decomp(x, cross_out, consts["A"])
    y = ffn(x, p["w_ff1"], p["w_ff2"], act)
    x, trend3 = add_decomp(x, y, consts["A"])
    residual_trend = trend1 + trend2 + trend3
    residual_trend = trend_projection(residual_trend, p["w_trend"])
    return x, residual_trend


def proformer_forward(params, consts_enc, consts_dec,
                      x_enc, x_mark_enc, x_dec, x_mark_dec,
                      *, cfg, label_len, pred_len):
    B = x_enc.shape[0]

    # decomposition init
    mean = jnp.mean(x_enc, axis=1, keepdims=True)
    mean = jnp.tile(mean, (1, pred_len, 1))
    zeros = jnp.zeros((B, pred_len, x_dec.shape[2]), jnp.float32)
    seasonal_init, trend_init = series_decomp(x_enc, consts_enc["A"])
    trend_init = jnp.concatenate([trend_init[:, -label_len:, :], mean], axis=1)
    seasonal_init = jnp.concatenate([seasonal_init[:, -label_len:, :], zeros], axis=1)

    # encoder
    enc_out = data_embedding(params["enc_emb"], x_enc, x_mark_enc)
    for lp in params["enc_layers"]:
        enc_out = encoder_layer(lp, enc_out, consts_enc, cfg["factor"], cfg["activation"])
    enc_out = my_layernorm(enc_out, params["enc_norm_g"], params["enc_norm_b"])

    # decoder
    x = data_embedding(params["dec_emb"], seasonal_init, x_mark_dec)
    trend = trend_init
    for lp in params["dec_layers"]:
        x, residual_trend = decoder_layer(lp, x, enc_out, consts_dec,
                                          cfg["factor"], cfg["activation"])
        trend = trend + residual_trend
    x = my_layernorm(x, params["dec_norm_g"], params["dec_norm_b"])
    seasonal_part = linear(x, params["w_proj"], params["b_proj"], out_dtype=jnp.float32)

    dec_out = trend + seasonal_part
    # output_attention = False, final = False  ->  return dec_out[:, -pred_len:, :]
    return dec_out[:, -pred_len:, :]


# ----------------------------------------------------------------------------- #
# Deterministic synthetic parameter initialization (MXU weights stored bf16)
# ----------------------------------------------------------------------------- #
def init_params(key, cfg):
    d_model, d_ff = cfg["d_model"], cfg["d_ff"]
    enc_in, dec_in = cfg["enc_in"], cfg["dec_in"]
    c_out, mark = cfg["c_out"], cfg["mark_dim"]
    counter = [0]

    def nxt():
        counter[0] += 1
        return jax.random.fold_in(key, counter[0])

    def w(shape, scale=0.1):
        return (jax.random.normal(nxt(), shape, jnp.float32) * scale).astype(MXU_DTYPE)

    def bvec(n, scale=0.1):
        return jax.random.normal(nxt(), (n,), jnp.float32) * scale

    def attn():
        return dict(w_q=w((d_model, d_model)), b_q=bvec(d_model),
                    w_k=w((d_model, d_model)), b_k=bvec(d_model),
                    w_v=w((d_model, d_model)), b_v=bvec(d_model),
                    w_o=w((d_model, d_model)), b_o=bvec(d_model))

    def emb(c_in):
        # stacked [w_prev; w_cur; w_next; w_timef]  ->  (3*c_in + mark, d_model)
        return dict(w_emb=w((3 * c_in + mark, d_model)))

    enc_layers = [dict(attn=attn(),
                       w_ff1=w((d_model, d_ff)),
                       w_ff2=w((d_ff, d_model)))
                  for _ in range(cfg["e_layers"])]
    dec_layers = [dict(self_attn=attn(), cross_attn=attn(),
                       w_ff1=w((d_model, d_ff)),
                       w_ff2=w((d_ff, d_model)),
                       w_trend=w((3 * d_model, c_out)))
                  for _ in range(cfg["d_layers"])]

    return dict(enc_emb=emb(enc_in), dec_emb=emb(dec_in),
                enc_layers=enc_layers, dec_layers=dec_layers,
                enc_norm_g=jnp.ones((d_model,), jnp.float32),
                enc_norm_b=jnp.zeros((d_model,), jnp.float32),
                dec_norm_g=jnp.ones((d_model,), jnp.float32),
                dec_norm_b=jnp.zeros((d_model,), jnp.float32),
                w_proj=w((d_model, c_out)), b_proj=bvec(c_out))


# ----------------------------------------------------------------------------- #
# Main
# ----------------------------------------------------------------------------- #
if __name__ == "__main__":
    cfg = dict(enc_in=4, dec_in=4, c_out=4, mark_dim=4,       # freq='h' -> 4 time features
               d_model=32, n_heads=4, d_ff=32, moving_avg=5,
               factor=1, e_layers=1, d_layers=1,
               activation="relu", output_attention=False)
    # NOTE: n_heads only splits channels; AutoCorrelation acts per-channel, so the
    # head split is mathematically transparent and folded into D = d_model.

    B, seq_len, label_len, pred_len = 2, 16, 8, 8

    key = jax.random.PRNGKey(0)
    kparam, kdata = jax.random.split(key)
    params = init_params(kparam, cfg)

    # host-precomputed constants (moving-average matrix, DFT matrices)
    consts_enc = make_consts(seq_len, cfg["moving_avg"])
    consts_dec = make_consts(label_len + pred_len, cfg["moving_avg"])

    k1, k2, k3, k4 = jax.random.split(kdata, 4)
    x_enc = jax.random.normal(k1, (B, seq_len, cfg["enc_in"]), jnp.float32)
    x_mark_enc = jax.random.normal(k2, (B, seq_len, cfg["mark_dim"]), jnp.float32)
    x_dec = jax.random.normal(k3, (B, label_len + pred_len, cfg["dec_in"]), jnp.float32)
    x_mark_dec = jax.random.normal(k4, (B, label_len + pred_len, cfg["mark_dim"]), jnp.float32)

    fwd = jax.jit(functools.partial(proformer_forward, cfg=cfg,
                                    label_len=label_len, pred_len=pred_len))
    out = fwd(params, consts_enc, consts_dec, x_enc, x_mark_enc, x_dec, x_mark_dec)
    out = jax.block_until_ready(out)

    assert out.shape == (B, pred_len, cfg["c_out"]), out.shape
    assert bool(jnp.all(jnp.isfinite(out)))
    print("KERNEL_OK")
</pallas_src>

<mosaic_0001>
module attributes {stable_mosaic.version = 11 : i64} {
  func.func @_decomp_kernel(%arg0: i32, %arg1: memref<1x16x4xf32, #tpu.memory_space<vmem>>, %arg2: memref<16x16xf32, #tpu.memory_space<vmem>>, %arg3: memref<1x16x4xf32, #tpu.memory_space<vmem>>, %arg4: memref<1x16x4xf32, #tpu.memory_space<vmem>>) attributes {dimension_semantics = [#tpu.dimension_semantics<parallel>], iteration_bounds = array<i64: 2>, scalar_prefetch = 0 : i64, scratch_operands = 0 : i64, tpu.core_type = #tpu.core_type<tc>, window_params = [{transform_indices = @transform_0, window_bounds = array<i64: 1, 16, 4>}, {pipeline_mode = #tpu.pipeline_mode<synchronous>, transform_indices = @transform_1, window_bounds = array<i64: 16, 16>}, {transform_indices = @transform_2, window_bounds = array<i64: 1, 16, 4>}, {transform_indices = @transform_3, window_bounds = array<i64: 1, 16, 4>}]} {
    %c0 = arith.constant 0 : index
    %c0_0 = arith.constant 0 : index
    %c0_1 = arith.constant 0 : index
    %0 = vector.load %arg1[%c0, %c0_0, %c0_1] : memref<1x16x4xf32, #tpu.memory_space<vmem>>, vector<1x16x4xf32>
    %1 = vector.shape_cast %0 : vector<1x16x4xf32> to vector<16x4xf32>
    %c0_2 = arith.constant 0 : index
    %c0_3 = arith.constant 0 : index
    %2 = vector.load %arg2[%c0_2, %c0_3] : memref<16x16xf32, #tpu.memory_space<vmem>>, vector<16x16xf32>
    %cst = arith.constant dense<0.000000e+00> : vector<16x4xf32>
    %3 = tpu.matmul %2, %1, %cst {dimension_numbers = #tpu.dot_dimension_numbers<[1], [0], [0], [1], [0, 0, 1, 1], [], []>} : vector<16x16xf32>, vector<16x4xf32>, vector<16x4xf32> -> vector<16x4xf32>
    %c0_4 = arith.constant 0 : index
    %c0_5 = arith.constant 0 : index
    %c0_6 = arith.constant 0 : index
    %4 = vector.load %arg4[%c0_4, %c0_5, %c0_6] : memref<1x16x4xf32, #tpu.memory_space<vmem>>, vector<1x16x4xf32>
    %5 = vector.shape_cast %4 : vector<1x16x4xf32> to vector<16x4xf32>
    %6 = vector.shape_cast %3 : vector<16x4xf32> to vector<1x16x4xf32>
    tpu.vector_store %arg4[%c0_4, %c0_5, %c0_6], %6 {strides = array<i32>} : memref<1x16x4xf32, #tpu.memory_space<vmem>>, vector<1x16x4xf32>,
    %7 = arith.subf %1, %3 : vector<16x4xf32>
    %c0_7 = arith.constant 0 : index
    %c0_8 = arith.constant 0 : index
    %c0_9 = arith.constant 0 : index
    %8 = vector.load %arg3[%c0_7, %c0_8, %c0_9] : memref<1x16x4xf32, #tpu.memory_space<vmem>>, vector<1x16x4xf32>
    %9 = vector.shape_cast %8 : vector<1x16x4xf32> to vector<16x4xf32>
    %10 = vector.shape_cast %7 : vector<16x4xf32> to vector<1x16x4xf32>
    tpu.vector_store %arg3[%c0_7, %c0_8, %c0_9], %10 {strides = array<i32>} : memref<1x16x4xf32, #tpu.memory_space<vmem>>, vector<1x16x4xf32>,
    return
  }
  func.func @transform_0(%arg0: i32) -> (i32, i32, i32) {
    %c0_i32 = arith.constant 0 : i32
    %c0_i32_0 = arith.constant 0 : i32
    %c0_i32_1 = arith.constant 0 : i32
    return %arg0, %c0_i32, %c0_i32_0 : i32, i32, i32
  }
  func.func @transform_1(%arg0: i32) -> (i32, i32) {
    %c0_i32 = arith.constant 0 : i32
    %c0_i32_0 = arith.constant 0 : i32
    %c0_i32_1 = arith.constant 0 : i32
    return %c0_i32, %c0_i32_0 : i32, i32
  }
  func.func @transform_2(%arg0: i32) -> (i32, i32, i32) {
    %c0_i32 = arith.constant 0 : i32
    %c0_i32_0 = arith.constant 0 : i32
    %c0_i32_1 = arith.constant 0 : i32
    return %arg0, %c0_i32, %c0_i32_0 : i32, i32, i32
  }
  func.func @transform_3(%arg0: i32) -> (i32, i32, i32) {
    %c0_i32 = arith.constant 0 : i32
    %c0_i32_0 = arith.constant 0 : i32
    %c0_i32_1 = arith.constant 0 : i32
    return %arg0, %c0_i32, %c0_i32_0 : i32, i32, i32
  }
}

module attributes {stable_mosaic.version = 11 : i64} {
  func.func @_linear_kernel(%arg0: i32, %arg1: memref<32x16xf32, #tpu.memory_space<vmem>>, %arg2: memref<16x32xbf16, #tpu.memory_space<vmem>>, %arg3: memref<1x32xf32, #tpu.memory_space<vmem>>, %arg4: memref<32x32xf32, #tpu.memory_space<vmem>>) attributes {dimension_semantics = [#tpu.dimension_semantics<parallel>], iteration_bounds = array<i64: 1>, scalar_prefetch = 0 : i64, scratch_operands = 0 : i64, tpu.core_type = #tpu.core_type<tc>, window_params = [{transform_indices = @transform_0, window_bounds = array<i64: 32, 16>}, {pipeline_mode = #tpu.pipeline_mode<synchronous>, transform_indices = @transform_1, window_bounds = array<i64: 16, 32>}, {pipeline_mode = #tpu.pipeline_mode<synchronous>, transform_indices = @transform_2, window_bounds = array<i64: 1, 32>}, {transform_indices = @transform_3, window_bounds = array<i64: 32, 32>}]} {
    %c0 = arith.constant 0 : index
    %c0_0 = arith.constant 0 : index
    %0 = vector.load %arg1[%c0, %c0_0] : memref<32x16xf32, #tpu.memory_space<vmem>>, vector<32x16xf32>
    %1 = arith.truncf %0 : vector<32x16xf32> to vector<32x16xbf16>
    %c0_1 = arith.constant 0 : index
    %c0_2 = arith.constant 0 : index
    %2 = vector.load %arg2[%c0_1, %c0_2] : memref<16x32xbf16, #tpu.memory_space<vmem>>, vector<16x32xbf16>
    %cst = arith.constant dense<0.000000e+00> : vector<32x32xf32>
    %3 = tpu.matmul %1, %2, %cst {dimension_numbers = #tpu.dot_dimension_numbers<[1], [0], [0], [1], [0, 0, 1, 1], [], []>} : vector<32x16xbf16>, vector<16x32xbf16>, vector<32x32xf32> -> vector<32x32xf32>
    %c0_3 = arith.constant 0 : index
    %c0_4 = arith.constant 0 : index
    %4 = vector.load %arg3[%c0_3, %c0_4] : memref<1x32xf32, #tpu.memory_space<vmem>>, vector<1x32xf32>
    %5 = vector.broadcast %4 : vector<1x32xf32> to vector<32x32xf32>
    %6 = arith.addf %3, %5 : vector<32x32xf32>
    %c0_5 = arith.constant 0 : index
    %c0_6 = arith.constant 0 : index
    %7 = vector.load %arg4[%c0_5, %c0_6] : memref<32x32xf32, #tpu.memory_space<vmem>>, vector<32x32xf32>
    tpu.vector_store %arg4[%c0_5, %c0_6], %6 {strides = array<i32>} : memref<32x32xf32, #tpu.memory_space<vmem>>, vector<32x32xf32>,
    return
  }
  func.func @transform_0(%arg0: i32) -> (i32, i32) {
    %c0_i32 = arith.constant 0 : i32
    %c0_i32_0 = arith.constant 0 : i32
    return %arg0, %c0_i32 : i32, i32
  }
  func.func @transform_1(%arg0: i32) -> (i32, i32) {
    %c0_i32 = arith.constant 0 : i32
    %c0_i32_0 = arith.constant 0 : i32
    %c0_i32_1 = arith.constant 0 : i32
    return %c0_i32, %c0_i32_0 : i32, i32
  }
  func.func @transform_2(%arg0: i32) -> (i32, i32) {
    %c0_i32 = arith.constant 0 : i32
    %c0_i32_0 = arith.constant 0 : i32
    %c0_i32_1 = arith.constant 0 : i32
    return %c0_i32, %c0_i32_0 : i32, i32
  }
  func.func @transform_3(%arg0: i32) -> (i32, i32) {
    %c0_i32 = arith.constant 0 : i32
    %c0_i32_0 = arith.constant 0 : i32
    return %arg0, %c0_i32 : i32, i32
  }
}

module attributes {stable_mosaic.version = 11 : i64} {
  func.func @_qkv_kernel(%arg0: i32, %arg1: memref<32x32xf32, #tpu.memory_space<vmem>>, %arg2: memref<32x32xbf16, #tpu.memory_space<vmem>>, %arg3: memref<1x32xf32, #tpu.memory_space<vmem>>, %arg4: memref<32x32xbf16, #tpu.memory_space<vmem>>, %arg5: memref<1x32xf32, #tpu.memory_space<vmem>>, %arg6: memref<32x32xbf16, #tpu.memory_space<vmem>>, %arg7: memref<1x32xf32, #tpu.memory_space<vmem>>, %arg8: memref<32x32xbf16, #tpu.memory_space<vmem>>, %arg9: memref<32x32xbf16, #tpu.memory_space<vmem>>, %arg10: memref<32x32xbf16, #tpu.memory_space<vmem>>) attributes {dimension_semantics = [#tpu.dimension_semantics<parallel>], iteration_bounds = array<i64: 1>, scalar_prefetch = 0 : i64, scratch_operands = 0 : i64, tpu.core_type = #tpu.core_type<tc>, window_params = [{transform_indices = @transform_0, window_bounds = array<i64: 32, 32>}, {pipeline_mode = #tpu.pipeline_mode<synchronous>, transform_indices = @transform_1, window_bounds = array<i64: 32, 32>}, {pipeline_mode = #tpu.pipeline_mode<synchronous>, transform_indices = @transform_2, window_bounds = array<i64: 1, 32>}, {pipeline_mode = #tpu.pipeline_mode<synchronous>, transform_indices = @transform_3, window_bounds = array<i64: 32, 32>}, {pipeline_mode = #tpu.pipeline_mode<synchronous>, transform_indices = @transform_4, window_bounds = array<i64: 1, 32>}, {pipeline_mode = #tpu.pipeline_mode<synchronous>, transform_indices = @transform_5, window_bounds = array<i64: 32, 32>}, {pipeline_mode = #tpu.pipeline_mode<synchronous>, transform_indices = @transform_6, window_bounds = array<i64: 1, 32>}, {transform_indices = @transform_7, window_bounds = array<i64: 32, 32>}, {transform_indices = @transform_8, window_bounds = array<i64: 32, 32>}, {transform_indices = @transform_9, window_bounds = array<i64: 32, 32>}]} {
    %c0 = arith.constant 0 : index
    %c0_0 = arith.constant 0 : index
    %0 = vector.load %arg1[%c0, %c0_0] : memref<32x32xf32, #tpu.memory_space<vmem>>, vector<32x32xf32>
    %1 = arith.truncf %0 : vector<32x32xf32> to vector<32x32xbf16>
    %c0_1 = arith.constant 0 : index
    %c0_2 = arith.constant 0 : index
    %2 = vector.load %arg2[%c0_1, %c0_2] : memref<32x32xbf16, #tpu.memory_space<vmem>>, vector<32x32xbf16>
    %cst = arith.constant dense<0.000000e+00> : vector<32x32xf32>
    %3 = tpu.matmul %1, %2, %cst {dimension_numbers = #tpu.dot_dimension_numbers<[1], [0], [0], [1], [0, 0, 1, 1], [], []>} : vector<32x32xbf16>, vector<32x32xbf16>, vector<32x32xf32> -> vector<32x32xf32>
    %c0_3 = arith.constant 0 : index
    %c0_4 = arith.constant 0 : index
    %4 = vector.load %arg3[%c0_3, %c0_4] : memref<1x32xf32, #tpu.memory_space<vmem>>, vector<1x32xf32>
    %5 = vector.broadcast %4 : vector<1x32xf32> to vector<32x32xf32>
    %6 = arith.addf %3, %5 : vector<32x32xf32>
    %7 = arith.truncf %6 : vector<32x32xf32> to vector<32x32xbf16>
    %c0_5 = arith.constant 0 : index
    %c0_6 = arith.constant 0 : index
    %8 = vector.load %arg8[%c0_5, %c0_6] : memref<32x32xbf16, #tpu.memory_space<vmem>>, vector<32x32xbf16>
    tpu.vector_store %arg8[%c0_5, %c0_6], %7 {strides = array<i32>} : memref<32x32xbf16, #tpu.memory_space<vmem>>, vector<32x32xbf16>,
    %c0_7 = arith.constant 0 : index
    %c0_8 = arith.constant 0 : index
    %9 = vector.load %arg4[%c0_7, %c0_8] : memref<32x32xbf16, #tpu.memory_space<vmem>>, vector<32x32xbf16>
    %cst_9 = arith.constant dense<0.000000e+00> : vector<32x32xf32>
    %10 = tpu.matmul %1, %9, %cst_9 {dimension_numbers = #tpu.dot_dimension_numbers<[1], [0], [0], [1], [0, 0, 1, 1], [], []>} : vector<32x32xbf16>, vector<32x32xbf16>, vector<32x32xf32> -> vector<32x32xf32>
    %c0_10 = arith.constant 0 : index
    %c0_11 = arith.constant 0 : index
    %11 = vector.load %arg5[%c0_10, %c0_11] : memref<1x32xf32, #tpu.memory_space<vmem>>, vector<1x32xf32>
    %12 = vector.broadcast %11 : vector<1x32xf32> to vector<32x32xf32>
    %13 = arith.addf %10, %12 : vector<32x32xf32>
    %14 = arith.truncf %13 : vector<32x32xf32> to vector<32x32xbf16>
    %c0_12 = arith.constant 0 : index
    %c0_13 = arith.constant 0 : index
    %15 = vector.load %arg9[%c0_12, %c0_13] : memref<32x32xbf16, #tpu.memory_space<vmem>>, vector<32x32xbf16>
    tpu.vector_store %arg9[%c0_12, %c0_13], %14 {strides = array<i32>} : memref<32x32xbf16, #tpu.memory_space<vmem>>, vector<32x32xbf16>,
    %c0_14 = arith.constant 0 : index
    %c0_15 = arith.constant 0 : index
    %16 = vector.load %arg6[%c0_14, %c0_15] : memref<32x32xbf16, #tpu.memory_space<vmem>>, vector<32x32xbf16>
    %cst_16 = arith.constant dense<0.000000e+00> : vector<32x32xf32>
    %17 = tpu.matmul %1, %16, %cst_16 {dimension_numbers = #tpu.dot_dimension_numbers<[1], [0], [0], [1], [0, 0, 1, 1], [], []>} : vector<32x32xbf16>, vector<32x32xbf16>, vector<32x32xf32> -> vector<32x32xf32>
    %c0_17 = arith.constant 0 : index
    %c0_18 = arith.constant 0 : index
    %18 = vector.load %arg7[%c0_17, %c0_18] : memref<1x32xf32, #tpu.memory_space<vmem>>, vector<1x32xf32>
    %19 = vector.broadcast %18 : vector<1x32xf32> to vector<32x32xf32>
    %20 = arith.addf %17, %19 : vector<32x32xf32>
    %21 = arith.truncf %20 : vector<32x32xf32> to vector<32x32xbf16>
    %c0_19 = arith.constant 0 : index
    %c0_20 = arith.constant 0 : index
    %22 = vector.load %arg10[%c0_19, %c0_20] : memref<32x32xbf16, #tpu.memory_space<vmem>>, vector<32x32xbf16>
    tpu.vector_store %arg10[%c0_19, %c0_20], %21 {strides = array<i32>} : memref<32x32xbf16, #tpu.memory_space<vmem>>, vector<32x32xbf16>,
    return
  }
  func.func @transform_0(%arg0: i32) -> (i32, i32) {
    %c0_i32 = arith.constant 0 : i32
    %c0_i32_0 = arith.constant 0 : i32
    return %arg0, %c0_i32 : i32, i32
  }
  func.func @transform_1(%arg0: i32) -> (i32, i32) {
    %c0_i32 = arith.constant 0 : i32
    %c0_i32_0 = arith.constant 0 : i32
    %c0_i32_1 = arith.constant 0 : i32
    return %c0_i32, %c0_i32_0 : i32, i32
  }
  func.func @transform_2(%arg0: i32) -> (i32, i32) {
    %c0_i32 = arith.constant 0 : i32
    %c0_i32_0 = arith.constant 0 : i32
    %c0_i32_1 = arith.constant 0 : i32
    return %c0_i32, %c0_i32_0 : i32, i32
  }
  func.func @transform_3(%arg0: i32) -> (i32, i32) {
    %c0_i32 = arith.constant 0 : i32
    %c0_i32_0 = arith.constant 0 : i32
    %c0_i32_1 = arith.constant 0 : i32
    return %c0_i32, %c0_i32_0 : i32, i32
  }
  func.func @transform_4(%arg0: i32) -> (i32, i32) {
    %c0_i32 = arith.constant 0 : i32
    %c0_i32_0 = arith.constant 0 : i32
    %c0_i32_1 = arith.constant 0 : i32
    return %c0_i32, %c0_i32_0 : i32, i32
  }
  func.func @transform_5(%arg0: i32) -> (i32, i32) {
    %c0_i32 = arith.constant 0 : i32
    %c0_i32_0 = arith.constant 0 : i32
    %c0_i32_1 = arith.constant 0 : i32
    return %c0_i32, %c0_i32_0 : i32, i32
  }
  func.func @transform_6(%arg0: i32) -> (i32, i32) {
    %c0_i32 = arith.constant 0 : i32
    %c0_i32_0 = arith.constant 0 : i32
    %c0_i32_1 = arith.constant 0 : i32
    return %c0_i32, %c0_i32_0 : i32, i32
  }
  func.func @transform_7(%arg0: i32) -> (i32, i32) {
    %c0_i32 = arith.constant 0 : i32
    %c0_i32_0 = arith.constant 0 : i32
    return %arg0, %c0_i32 : i32, i32
  }
  func.func @transform_8(%arg0: i32) -> (i32, i32) {
    %c0_i32 = arith.constant 0 : i32
    %c0_i32_0 = arith.constant 0 : i32
    return %arg0, %c0_i32 : i32, i32
  }
  func.func @transform_9(%arg0: i32) -> (i32, i32) {
    %c0_i32 = arith.constant 0 : i32
    %c0_i32_0 = arith.constant 0 : i32
    return %arg0, %c0_i32 : i32, i32
  }
}

module attributes {stable_mosaic.version = 11 : i64} {
  func.func @_autocorr_kernel(%arg0: i32, %arg1: memref<1x16x32xbf16, #tpu.memory_space<vmem>>, %arg2: memref<1x16x32xbf16, #tpu.memory_space<vmem>>, %arg3: memref<1x16x32xbf16, #tpu.memory_space<vmem>>, %arg4: memref<16x16xf32, #tpu.memory_space<vmem>>, %arg5: memref<16x16xf32, #tpu.memory_space<vmem>>, %arg6: memref<1x16x32xbf16, #tpu.memory_space<vmem>>) attributes {dimension_semantics = [#tpu.dimension_semantics<parallel>], iteration_bounds = array<i64: 2>, scalar_prefetch = 0 : i64, scratch_operands = 0 : i64, tpu.core_type = #tpu.core_type<tc>, window_params = [{transform_indices = @transform_0, window_bounds = array<i64: 1, 16, 32>}, {transform_indices = @transform_1, window_bounds = array<i64: 1, 16, 32>}, {transform_indices = @transform_2, window_bounds = array<i64: 1, 16, 32>}, {pipeline_mode = #tpu.pipeline_mode<synchronous>, transform_indices = @transform_3, window_bounds = array<i64: 16, 16>}, {pipeline_mode = #tpu.pipeline_mode<synchronous>, transform_indices = @transform_4, window_bounds = array<i64: 16, 16>}, {transform_indices = @transform_5, window_bounds = array<i64: 1, 16, 32>}]} {
    %c0 = arith.constant 0 : index
    %c0_0 = arith.constant 0 : index
    %c0_1 = arith.constant 0 : index
    %0 = vector.load %arg1[%c0, %c0_0, %c0_1] : memref<1x16x32xbf16, #tpu.memory_space<vmem>>, vector<1x16x32xbf16>
    %1 = vector.shape_cast %0 : vector<1x16x32xbf16> to vector<16x32xbf16>
    %c0_2 = arith.constant 0 : index
    %c0_3 = arith.constant 0 : index
    %c0_4 = arith.constant 0 : index
    %2 = vector.load %arg2[%c0_2, %c0_3, %c0_4] : memref<1x16x32xbf16, #tpu.memory_space<vmem>>, vector<1x16x32xbf16>
    %3 = vector.shape_cast %2 : vector<1x16x32xbf16> to vector<16x32xbf16>
    %c0_5 = arith.constant 0 : index
    %c0_6 = arith.constant 0 : index
    %c0_7 = arith.constant 0 : index
    %4 = vector.load %arg3[%c0_5, %c0_6, %c0_7] : memref<1x16x32xbf16, #tpu.memory_space<vmem>>, vector<1x16x32xbf16>
    %5 = vector.shape_cast %4 : vector<1x16x32xbf16> to vector<16x32xbf16>
    %c0_8 = arith.constant 0 : index
    %c0_9 = arith.constant 0 : index
    %6 = vector.load %arg4[%c0_8, %c0_9] : memref<16x16xf32, #tpu.memory_space<vmem>>, vector<16x16xf32>
    %c0_10 = arith.constant 0 : index
    %c0_11 = arith.constant 0 : index
    %7 = vector.load %arg5[%c0_10, %c0_11] : memref<16x16xf32, #tpu.memory_space<vmem>>, vector<16x16xf32>
    %8 = arith.truncf %6 : vector<16x16xf32> to vector<16x16xbf16>
    %9 = arith.truncf %7 : vector<16x16xf32> to vector<16x16xbf16>
    %cst = arith.constant dense<0.000000e+00> : vector<16x32xf32>
    %10 = tpu.matmul %8, %1, %cst {dimension_numbers = #tpu.dot_dimension_numbers<[1], [0], [0], [1], [0, 0, 1, 1], [], []>} : vector<16x16xbf16>, vector<16x32xbf16>, vector<16x32xf32> -> vector<16x32xf32>
    %cst_12 = arith.constant dense<0.000000e+00> : vector<16x32xf32>
    %11 = tpu.matmul %9, %1, %cst_12 {dimension_numbers = #tpu.dot_dimension_numbers<[1], [0], [0], [1], [0, 0, 1, 1], [], []>} : vector<16x16xbf16>, vector<16x32xbf16>, vector<16x32xf32> -> vector<16x32xf32>
    %cst_13 = arith.constant 0.000000e+00 : f32
    %12 = vector.broadcast %cst_13 : f32 to vector<16x32xf32>
    %13 = arith.subf %12, %11 : vector<16x32xf32>
    %cst_14 = arith.constant dense<0.000000e+00> : vector<16x32xf32>
    %14 = tpu.matmul %8, %3, %cst_14 {dimension_numbers = #tpu.dot_dimension_numbers<[1], [0], [0], [1], [0, 0, 1, 1], [], []>} : vector<16x16xbf16>, vector<16x32xbf16>, vector<16x32xf32> -> vector<16x32xf32>
    %cst_15 = arith.constant dense<0.000000e+00> : vector<16x32xf32>
    %15 = tpu.matmul %9, %3, %cst_15 {dimension_numbers = #tpu.dot_dimension_numbers<[1], [0], [0], [1], [0, 0, 1, 1], [], []>} : vector<16x16xbf16>, vector<16x32xbf16>, vector<16x32xf32> -> vector<16x32xf32>
    %cst_16 = arith.constant 0.000000e+00 : f32
    %16 = vector.broadcast %cst_16 : f32 to vector<16x32xf32>
    %17 = arith.subf %16, %15 : vector<16x32xf32>
    %18 = arith.mulf %10, %14 : vector<16x32xf32>
    %19 = arith.mulf %13, %17 : vector<16x32xf32>
    %20 = arith.addf %18, %19 : vector<16x32xf32>
    %cst_17 = arith.constant dense<0.000000e+00> : vector<16xf32>
    %21 = vector.multi_reduction <add>, %20, %cst_17 [1] : vector<16x32xf32> to vector<16xf32>
    %22 = vector.shape_cast %21 : vector<16xf32> to vector<16x1xf32>
    %23 = arith.mulf %13, %14 : vector<16x32xf32>
    %24 = arith.mulf %10, %17 : vector<16x32xf32>
    %25 = arith.subf %23, %24 : vector<16x32xf32>
    %cst_18 = arith.constant dense<0.000000e+00> : vector<16xf32>
    %26 = vector.multi_reduction <add>, %25, %cst_18 [1] : vector<16x32xf32> to vector<16xf32>
    %27 = vector.shape_cast %26 : vector<16xf32> to vector<16x1xf32>
    %cst_19 = arith.constant dense<0.000000e+00> : vector<16x1xf32>
    %28 = tpu.matmul %6, %22, %cst_19 {dimension_numbers = #tpu.dot_dimension_numbers<[1], [0], [0], [1], [0, 0, 1, 1], [], []>} : vector<16x16xf32>, vector<16x1xf32>, vector<16x1xf32> -> vector<16x1xf32>
    %cst_20 = arith.constant dense<0.000000e+00> : vector<16x1xf32>
    %29 = tpu.matmul %7, %27, %cst_20 {dimension_numbers = #tpu.dot_dimension_numbers<[1], [0], [0], [1], [0, 0, 1, 1], [], []>} : vector<16x16xf32>, vector<16x1xf32>, vector<16x1xf32> -> vector<16x1xf32>
    %30 = arith.subf %28, %29 : vector<16x1xf32>
    %cst_21 = arith.constant 0.001953125 : f32
    %31 = vector.broadcast %cst_21 : f32 to vector<16x1xf32>
    %32 = arith.mulf %30, %31 : vector<16x1xf32>
    %33 = tpu.iota {dimensions = array<i32: 0>} : vector<16x1xi32>
    %34 = vector.shape_cast %32 : vector<16x1xf32> to vector<1x16x1xf32>
    %cst_22 = arith.constant dense<0xFF800000> : vector<1xf32>
    %35 = vector.multi_reduction <maximumf>, %34, %cst_22 [1, 2] : vector<1x16x1xf32> to vector<1xf32>
    %36 = vector.shape_cast %35 : vector<1xf32> to vector<1x1x1xf32>
    %37 = vector.extract %36[0, 0, 0] : f32 from vector<1x1x1xf32>
    %38 = vector.broadcast %37 : f32 to vector<16x1xf32>
    %39 = arith.cmpf oeq, %32, %38 : vector<16x1xf32>
    %c16_i32 = arith.constant 16 : i32
    %40 = vector.broadcast %c16_i32 : i32 to vector<16x1xi32>
    %41 = arith.select %39, %33, %40 : vector<16x1xi1>, vector<16x1xi32>
    %42 = vector.shape_cast %41 : vector<16x1xi32> to vector<1x16x1xi32>
    %cst_23 = arith.constant dense<2147483647> : vector<1xi32>
    %43 = vector.multi_reduction <minsi>, %42, %cst_23 [1, 2] : vector<1x16x1xi32> to vector<1xi32>
    %44 = vector.shape_cast %43 : vector<1xi32> to vector<1x1x1xi32>
    %45 = vector.extract %44[0, 0, 0] : i32 from vector<1x1x1xi32>
    %46 = vector.broadcast %45 : i32 to vector<16x1xi32>
    %47 = arith.cmpi eq, %33, %46 : vector<16x1xi32>
    %cst_24 = arith.constant -1.000000e+30 : f32
    %48 = vector.broadcast %cst_24 : f32 to vector<16x1xf32>
    %49 = arith.select %47, %48, %32 : vector<16x1xi1>, vector<16x1xf32>
    %50 = vector.shape_cast %49 : vector<16x1xf32> to vector<1x16x1xf32>
    %cst_25 = arith.constant dense<0xFF800000> : vector<1xf32>
    %51 = vector.multi_reduction <maximumf>, %50, %cst_25 [1, 2] : vector<1x16x1xf32> to vector<1xf32>
    %52 = vector.shape_cast %51 : vector<1xf32> to vector<1x1x1xf32>
    %53 = vector.extract %52[0, 0, 0] : f32 from vector<1x1x1xf32>
    %54 = vector.broadcast %53 : f32 to vector<16x1xf32>
    %55 = arith.cmpf oeq, %49, %54 : vector<16x1xf32>
    %c16_i32_26 = arith.constant 16 : i32
    %56 = vector.broadcast %c16_i32_26 : i32 to vector<16x1xi32>
    %57 = arith.select %55, %33, %56 : vector<16x1xi1>, vector<16x1xi32>
    %58 = vector.shape_cast %57 : vector<16x1xi32> to vector<1x16x1xi32>
    %cst_27 = arith.constant dense<2147483647> : vector<1xi32>
    %59 = vector.multi_reduction <minsi>, %58, %cst_27 [1, 2] : vector<1x16x1xi32> to vector<1xi32>
    %60 = vector.shape_cast %59 : vector<1xi32> to vector<1x1x1xi32>
    %61 = vector.extract %60[0, 0, 0] : i32 from vector<1x1x1xi32>
    %62 = arith.subf %37, %37 : f32
    %63 = math.exp %62 : f32
    %64 = arith.subf %53, %37 : f32
    %65 = math.exp %64 : f32
    %66 = arith.addf %63, %65 : f32
    %67 = arith.divf %63, %66 : f32
    %68 = arith.divf %65, %66 : f32
    %69 = tpu.iota {dimensions = array<i32: 0>} : vector<16x16xi32>
    %70 = tpu.iota {dimensions = array<i32: 1>} : vector<16x16xi32>
    %71 = arith.subi %70, %69 : vector<16x16xi32>
    %c16_i32_28 = arith.constant 16 : i32
    %72 = vector.broadcast %c16_i32_28 : i32 to vector<16x16xi32>
    %73 = arith.addi %71, %72 : vector<16x16xi32>
    %c16_i32_29 = arith.constant 16 : i32
    %c0_i32 = arith.constant 0 : i32
    %74 = arith.cmpi eq, %c16_i32_29, %c0_i32 : i32
    %c1_i32 = arith.constant 1 : i32
    %75 = arith.select %74, %c1_i32, %c16_i32_29 : i32
    %76 = vector.broadcast %75 : i32 to vector<16x16xi32>
    %77 = arith.remsi %73, %76 : vector<16x16xi32>
    %c0_i32_30 = arith.constant 0 : i32
    %78 = vector.broadcast %c0_i32_30 : i32 to vector<16x16xi32>
    %79 = arith.cmpi ne, %77, %78 : vector<16x16xi32>
    %c0_i32_31 = arith.constant 0 : i32
    %80 = vector.broadcast %c0_i32_31 : i32 to vector<16x16xi32>
    %81 = arith.cmpi slt, %77, %80 : vector<16x16xi32>
    %c0_i32_32 = arith.constant 0 : i32
    %82 = arith.cmpi slt, %75, %c0_i32_32 : i32
    %83 = vector.broadcast %82 : i1 to vector<16x16xi1>
    %84 = vector.broadcast %83 : vector<16x16xi1> to vector<16x16xi1>
    %85 = arith.xori %81, %84 : vector<16x16xi1>
    %86 = arith.andi %85, %79 : vector<16x16xi1>
    %87 = vector.broadcast %75 : i32 to vector<16x16xi32>
    %88 = arith.addi %77, %87 : vector<16x16xi32>
    %89 = arith.select %86, %88, %77 : vector<16x16xi1>, vector<16x16xi32>
    %cst_33 = arith.constant 0.000000e+00 : f32
    %90 = vector.broadcast %cst_33 : f32 to vector<16x16xf32>
    %91 = vector.broadcast %45 : i32 to vector<16x16xi32>
    %92 = arith.cmpi eq, %89, %91 : vector<16x16xi32>
    %cst_34 = arith.constant 0.000000e+00 : f32
    %93 = vector.broadcast %67 : f32 to vector<16x16xf32>
    %94 = vector.broadcast %cst_34 : f32 to vector<16x16xf32>
    %95 = arith.select %92, %93, %94 : vector<16x16xi1>, vector<16x16xf32>
    %96 = arith.addf %90, %95 : vector<16x16xf32>
    %97 = vector.broadcast %61 : i32 to vector<16x16xi32>
    %98 = arith.cmpi eq, %89, %97 : vector<16x16xi32>
    %cst_35 = arith.constant 0.000000e+00 : f32
    %99 = vector.broadcast %68 : f32 to vector<16x16xf32>
    %100 = vector.broadcast %cst_35 : f32 to vector<16x16xf32>
    %101 = arith.select %98, %99, %100 : vector<16x16xi1>, vector<16x16xf32>
    %102 = arith.addf %96, %101 : vector<16x16xf32>
    %103 = arith.truncf %102 : vector<16x16xf32> to vector<16x16xbf16>
    %cst_36 = arith.constant dense<0.000000e+00> : vector<16x32xf32>
    %104 = tpu.matmul %103, %5, %cst_36 {dimension_numbers = #tpu.dot_dimension_numbers<[1], [0], [0], [1], [0, 0, 1, 1], [], []>} : vector<16x16xbf16>, vector<16x32xbf16>, vector<16x32xf32> -> vector<16x32xf32>
    %105 = arith.truncf %104 : vector<16x32xf32> to vector<16x32xbf16>
    %c0_37 = arith.constant 0 : index
    %c0_38 = arith.constant 0 : index
    %c0_39 = arith.constant 0 : index
    %106 = vector.load %arg6[%c0_37, %c0_38, %c0_39] : memref<1x16x32xbf16, #tpu.memory_space<vmem>>, vector<1x16x32xbf16>
    %107 = vector.shape_cast %106 : vector<1x16x32xbf16> to vector<16x32xbf16>
    %108 = vector.shape_cast %105 : vector<16x32xbf16> to vector<1x16x32xbf16>
    tpu.vector_store %arg6[%c0_37, %c0_38, %c0_39], %108 {strides = array<i32>} : memref<1x16x32xbf16, #tpu.memory_space<vmem>>, vector<1x16x32xbf16>,
    return
  }
  func.func @transform_0(%arg0: i32) -> (i32, i32, i32) {
    %c0_i32 = arith.constant 0 : i32
    %c0_i32_0 = arith.constant 0 : i32
    %c0_i32_1 = arith.constant 0 : i32
    return %arg0, %c0_i32, %c0_i32_0 : i32, i32, i32
  }
  func.func @transform_1(%arg0: i32) -> (i32, i32, i32) {
    %c0_i32 = arith.constant 0 : i32
    %c0_i32_0 = arith.constant 0 : i32
    %c0_i32_1 = arith.constant 0 : i32
    return %arg0, %c0_i32, %c0_i32_0 : i32, i32, i32
  }
  func.func @transform_2(%arg0: i32) -> (i32, i32, i32) {
    %c0_i32 = arith.constant 0 : i32
    %c0_i32_0 = arith.constant 0 : i32
    %c0_i32_1 = arith.constant 0 : i32
    return %arg0, %c0_i32, %c0_i32_0 : i32, i32, i32
  }
  func.func @transform_3(%arg0: i32) -> (i32, i32) {
    %c0_i32 = arith.constant 0 : i32
    %c0_i32_0 = arith.constant 0 : i32
    %c0_i32_1 = arith.constant 0 : i32
    return %c0_i32, %c0_i32_0 : i32, i32
  }
  func.func @transform_4(%arg0: i32) -> (i32, i32) {
    %c0_i32 = arith.constant 0 : i32
    %c0_i32_0 = arith.constant 0 : i32
    %c0_i32_1 = arith.constant 0 : i32
    return %c0_i32, %c0_i32_0 : i32, i32
  }
  func.func @transform_5(%arg0: i32) -> (i32, i32, i32) {
    %c0_i32 = arith.constant 0 : i32
    %c0_i32_0 = arith.constant 0 : i32
    %c0_i32_1 = arith.constant 0 : i32
    return %arg0, %c0_i32, %c0_i32_0 : i32, i32, i32
  }
}

module attributes {stable_mosaic.version = 11 : i64} {
  func.func @_linear_kernel(%arg0: i32, %arg1: memref<32x32xbf16, #tpu.memory_space<vmem>>, %arg2: memref<32x32xbf16, #tpu.memory_space<vmem>>, %arg3: memref<1x32xf32, #tpu.memory_space<vmem>>, %arg4: memref<32x32xf32, #tpu.memory_space<vmem>>) attributes {dimension_semantics = [#tpu.dimension_semantics<parallel>], iteration_bounds = array<i64: 1>, scalar_prefetch = 0 : i64, scratch_operands = 0 : i64, tpu.core_type = #tpu.core_type<tc>, window_params = [{transform_indices = @transform_0, window_bounds = array<i64: 32, 32>}, {pipeline_mode = #tpu.pipeline_mode<synchronous>, transform_indices = @transform_1, window_bounds = array<i64: 32, 32>}, {pipeline_mode = #tpu.pipeline_mode<synchronous>, transform_indices = @transform_2, window_bounds = array<i64: 1, 32>}, {transform_indices = @transform_3, window_bounds = array<i64: 32, 32>}]} {
    %c0 = arith.constant 0 : index
    %c0_0 = arith.constant 0 : index
    %0 = vector.load %arg1[%c0, %c0_0] : memref<32x32xbf16, #tpu.memory_space<vmem>>, vector<32x32xbf16>
    %c0_1 = arith.constant 0 : index
    %c0_2 = arith.constant 0 : index
    %1 = vector.load %arg2[%c0_1, %c0_2] : memref<32x32xbf16, #tpu.memory_space<vmem>>, vector<32x32xbf16>
    %cst = arith.constant dense<0.000000e+00> : vector<32x32xf32>
    %2 = tpu.matmul %0, %1, %cst {dimension_numbers = #tpu.dot_dimension_numbers<[1], [0], [0], [1], [0, 0, 1, 1], [], []>} : vector<32x32xbf16>, vector<32x32xbf16>, vector<32x32xf32> -> vector<32x32xf32>
    %c0_3 = arith.constant 0 : index
    %c0_4 = arith.constant 0 : index
    %3 = vector.load %arg3[%c0_3, %c0_4] : memref<1x32xf32, #tpu.memory_space<vmem>>, vector<1x32xf32>
    %4 = vector.broadcast %3 : vector<1x32xf32> to vector<32x32xf32>
    %5 = arith.addf %2, %4 : vector<32x32xf32>
    %c0_5 = arith.constant 0 : index
    %c0_6 = arith.constant 0 : index
    %6 = vector.load %arg4[%c0_5, %c0_6] : memref<32x32xf32, #tpu.memory_space<vmem>>, vector<32x32xf32>
    tpu.vector_store %arg4[%c0_5, %c0_6], %5 {strides = array<i32>} : memref<32x32xf32, #tpu.memory_space<vmem>>, vector<32x32xf32>,
    return
  }
  func.func @transform_0(%arg0: i32) -> (i32, i32) {
    %c0_i32 = arith.constant 0 : i32
    %c0_i32_0 = arith.constant 0 : i32
    return %arg0, %c0_i32 : i32, i32
  }
  func.func @transform_1(%arg0: i32) -> (i32, i32) {
    %c0_i32 = arith.constant 0 : i32
    %c0_i32_0 = arith.constant 0 : i32
    %c0_i32_1 = arith.constant 0 : i32
    return %c0_i32, %c0_i32_0 : i32, i32
  }
  func.func @transform_2(%arg0: i32) -> (i32, i32) {
    %c0_i32 = arith.constant 0 : i32
    %c0_i32_0 = arith.constant 0 : i32
    %c0_i32_1 = arith.constant 0 : i32
    return %c0_i32, %c0_i32_0 : i32, i32
  }
  func.func @transform_3(%arg0: i32) -> (i32, i32) {
    %c0_i32 = arith.constant 0 : i32
    %c0_i32_0 = arith.constant 0 : i32
    return %arg0, %c0_i32 : i32, i32
  }
}

module attributes {stable_mosaic.version = 11 : i64} {
  func.func @_add_decomp_kernel(%arg0: i32, %arg1: memref<1x16x32xf32, #tpu.memory_space<vmem>>, %arg2: memref<1x16x32xf32, #tpu.memory_space<vmem>>, %arg3: memref<16x16xf32, #tpu.memory_space<vmem>>, %arg4: memref<1x16x32xf32, #tpu.memory_space<vmem>>, %arg5: memref<1x16x32xf32, #tpu.memory_space<vmem>>) attributes {dimension_semantics = [#tpu.dimension_semantics<parallel>], iteration_bounds = array<i64: 2>, scalar_prefetch = 0 : i64, scratch_operands = 0 : i64, tpu.core_type = #tpu.core_type<tc>, window_params = [{transform_indices = @transform_0, window_bounds = array<i64: 1, 16, 32>}, {transform_indices = @transform_1, window_bounds = array<i64: 1, 16, 32>}, {pipeline_mode = #tpu.pipeline_mode<synchronous>, transform_indices = @transform_2, window_bounds = array<i64: 16, 16>}, {transform_indices = @transform_3, window_bounds = array<i64: 1, 16, 32>}, {transform_indices = @transform_4, window_bounds = array<i64: 1, 16, 32>}]} {
    %c0 = arith.constant 0 : index
    %c0_0 = arith.constant 0 : index
    %c0_1 = arith.constant 0 : index
    %0 = vector.load %arg1[%c0, %c0_0, %c0_1] : memref<1x16x32xf32, #tpu.memory_space<vmem>>, vector<1x16x32xf32>
    %1 = vector.shape_cast %0 : vector<1x16x32xf32> to vector<16x32xf32>
    %c0_2 = arith.constant 0 : index
    %c0_3 = arith.constant 0 : index
    %c0_4 = arith.constant 0 : index
    %2 = vector.load %arg2[%c0_2, %c0_3, %c0_4] : memref<1x16x32xf32, #tpu.memory_space<vmem>>, vector<1x16x32xf32>
    %3 = vector.shape_cast %2 : vector<1x16x32xf32> to vector<16x32xf32>
    %4 = arith.addf %1, %3 : vector<16x32xf32>
    %c0_5 = arith.constant 0 : index
    %c0_6 = arith.constant 0 : index
    %5 = vector.load %arg3[%c0_5, %c0_6] : memref<16x16xf32, #tpu.memory_space<vmem>>, vector<16x16xf32>
    %cst = arith.constant dense<0.000000e+00> : vector<16x32xf32>
    %6 = tpu.matmul %5, %4, %cst {dimension_numbers = #tpu.dot_dimension_numbers<[1], [0], [0], [1], [0, 0, 1, 1], [], []>} : vector<16x16xf32>, vector<16x32xf32>, vector<16x32xf32> -> vector<16x32xf32>
    %c0_7 = arith.constant 0 : index
    %c0_8 = arith.constant 0 : index
    %c0_9 = arith.constant 0 : index
    %7 = vector.load %arg5[%c0_7, %c0_8, %c0_9] : memref<1x16x32xf32, #tpu.memory_space<vmem>>, vector<1x16x32xf32>
    %8 = vector.shape_cast %7 : vector<1x16x32xf32> to vector<16x32xf32>
    %9 = vector.shape_cast %6 : vector<16x32xf32> to vector<1x16x32xf32>
    tpu.vector_store %arg5[%c0_7, %c0_8, %c0_9], %9 {strides = array<i32>} : memref<1x16x32xf32, #tpu.memory_space<vmem>>, vector<1x16x32xf32>,
    %10 = arith.subf %4, %6 : vector<16x32xf32>
    %c0_10 = arith.constant 0 : index
    %c0_11 = arith.constant 0 : index
    %c0_12 = arith.constant 0 : index
    %11 = vector.load %arg4[%c0_10, %c0_11, %c0_12] : memref<1x16x32xf32, #tpu.memory_space<vmem>>, vector<1x16x32xf32>
    %12 = vector.shape_cast %11 : vector<1x16x32xf32> to vector<16x32xf32>
    %13 = vector.shape_cast %10 : vector<16x32xf32> to vector<1x16x32xf32>
    tpu.vector_store %arg4[%c0_10, %c0_11, %c0_12], %13 {strides = array<i32>} : memref<1x16x32xf32, #tpu.memory_space<vmem>>, vector<1x16x32xf32>,
    return
  }
  func.func @transform_0(%arg0: i32) -> (i32, i32, i32) {
    %c0_i32 = arith.constant 0 : i32
    %c0_i32_0 = arith.constant 0 : i32
    %c0_i32_1 = arith.constant 0 : i32
    return %arg0, %c0_i32, %c0_i32_0 : i32, i32, i32
  }
  func.func @transform_1(%arg0: i32) -> (i32, i32, i32) {
    %c0_i32 = arith.constant 0 : i32
    %c0_i32_0 = arith.constant 0 : i32
    %c0_i32_1 = arith.constant 0 : i32
    return %arg0, %c0_i32, %c0_i32_0 : i32, i32, i32
  }
  func.func @transform_2(%arg0: i32) -> (i32, i32) {
    %c0_i32 = arith.constant 0 : i32
    %c0_i32_0 = arith.constant 0 : i32
    %c0_i32_1 = arith.constant 0 : i32
    return %c0_i32, %c0_i32_0 : i32, i32
  }
  func.func @transform_3(%arg0: i32) -> (i32, i32, i32) {
    %c0_i32 = arith.constant 0 : i32
    %c0_i32_0 = arith.constant 0 : i32
    %c0_i32_1 = arith.constant 0 : i32
    return %arg0, %c0_i32, %c0_i32_0 : i32, i32, i32
  }
  func.func @transform_4(%arg0: i32) -> (i32, i32, i32) {
    %c0_i32 = arith.constant 0 : i32
    %c0_i32_0 = arith.constant 0 : i32
    %c0_i32_1 = arith.constant 0 : i32
    return %arg0, %c0_i32, %c0_i32_0 : i32, i32, i32
  }
}

module attributes {stable_mosaic.version = 11 : i64} {
  func.func @_linear_kernel(%arg0: i32, %arg1: memref<32x32xf32, #tpu.memory_space<vmem>>, %arg2: memref<32x32xbf16, #tpu.memory_space<vmem>>, %arg3: memref<1x32xf32, #tpu.memory_space<vmem>>, %arg4: memref<32x32xbf16, #tpu.memory_space<vmem>>) attributes {dimension_semantics = [#tpu.dimension_semantics<parallel>], iteration_bounds = array<i64: 1>, scalar_prefetch = 0 : i64, scratch_operands = 0 : i64, tpu.core_type = #tpu.core_type<tc>, window_params = [{transform_indices = @transform_0, window_bounds = array<i64: 32, 32>}, {pipeline_mode = #tpu.pipeline_mode<synchronous>, transform_indices = @transform_1, window_bounds = array<i64: 32, 32>}, {pipeline_mode = #tpu.pipeline_mode<synchronous>, transform_indices = @transform_2, window_bounds = array<i64: 1, 32>}, {transform_indices = @transform_3, window_bounds = array<i64: 32, 32>}]} {
    %c0 = arith.constant 0 : index
    %c0_0 = arith.constant 0 : index
    %0 = vector.load %arg1[%c0, %c0_0] : memref<32x32xf32, #tpu.memory_space<vmem>>, vector<32x32xf32>
    %1 = arith.truncf %0 : vector<32x32xf32> to vector<32x32xbf16>
    %c0_1 = arith.constant 0 : index
    %c0_2 = arith.constant 0 : index
    %2 = vector.load %arg2[%c0_1, %c0_2] : memref<32x32xbf16, #tpu.memory_space<vmem>>, vector<32x32xbf16>
    %cst = arith.constant dense<0.000000e+00> : vector<32x32xf32>
    %3 = tpu.matmul %1, %2, %cst {dimension_numbers = #tpu.dot_dimension_numbers<[1], [0], [0], [1], [0, 0, 1, 1], [], []>} : vector<32x32xbf16>, vector<32x32xbf16>, vector<32x32xf32> -> vector<32x32xf32>
    %c0_3 = arith.constant 0 : index
    %c0_4 = arith.constant 0 : index
    %4 = vector.load %arg3[%c0_3, %c0_4] : memref<1x32xf32, #tpu.memory_space<vmem>>, vector<1x32xf32>
    %5 = vector.broadcast %4 : vector<1x32xf32> to vector<32x32xf32>
    %6 = arith.addf %3, %5 : vector<32x32xf32>
    %7 = arith.truncf %6 : vector<32x32xf32> to vector<32x32xbf16>
    %c0_5 = arith.constant 0 : index
    %c0_6 = arith.constant 0 : index
    %8 = vector.load %arg4[%c0_5, %c0_6] : memref<32x32xbf16, #tpu.memory_space<vmem>>, vector<32x32xbf16>
    tpu.vector_store %arg4[%c0_5, %c0_6], %7 {strides = array<i32>} : memref<32x32xbf16, #tpu.memory_space<vmem>>, vector<32x32xbf16>,
    return
  }
  func.func @transform_0(%arg0: i32) -> (i32, i32) {
    %c0_i32 = arith.constant 0 : i32
    %c0_i32_0 = arith.constant 0 : i32
    return %arg0, %c0_i32 : i32, i32
  }
  func.func @transform_1(%arg0: i32) -> (i32, i32) {
    %c0_i32 = arith.constant 0 : i32
    %c0_i32_0 = arith.constant 0 : i32
    %c0_i32_1 = arith.constant 0 : i32
    return %c0_i32, %c0_i32_0 : i32, i32
  }
  func.func @transform_2(%arg0: i32) -> (i32, i32) {
    %c0_i32 = arith.constant 0 : i32
    %c0_i32_0 = arith.constant 0 : i32
    %c0_i32_1 = arith.constant 0 : i32
    return %c0_i32, %c0_i32_0 : i32, i32
  }
  func.func @transform_3(%arg0: i32) -> (i32, i32) {
    %c0_i32 = arith.constant 0 : i32
    %c0_i32_0 = arith.constant 0 : i32
    return %arg0, %c0_i32 : i32, i32
  }
}

module attributes {stable_mosaic.version = 11 : i64} {
  func.func @_add_decomp_res_kernel(%arg0: i32, %arg1: memref<1x16x32xf32, #tpu.memory_space<vmem>>, %arg2: memref<1x16x32xf32, #tpu.memory_space<vmem>>, %arg3: memref<16x16xf32, #tpu.memory_space<vmem>>, %arg4: memref<1x16x32xf32, #tpu.memory_space<vmem>>) attributes {dimension_semantics = [#tpu.dimension_semantics<parallel>], iteration_bounds = array<i64: 2>, scalar_prefetch = 0 : i64, scratch_operands = 0 : i64, tpu.core_type = #tpu.core_type<tc>, window_params = [{transform_indices = @transform_0, window_bounds = array<i64: 1, 16, 32>}, {transform_indices = @transform_1, window_bounds = array<i64: 1, 16, 32>}, {pipeline_mode = #tpu.pipeline_mode<synchronous>, transform_indices = @transform_2, window_bounds = array<i64: 16, 16>}, {transform_indices = @transform_3, window_bounds = array<i64: 1, 16, 32>}]} {
    %c0 = arith.constant 0 : index
    %c0_0 = arith.constant 0 : index
    %c0_1 = arith.constant 0 : index
    %0 = vector.load %arg1[%c0, %c0_0, %c0_1] : memref<1x16x32xf32, #tpu.memory_space<vmem>>, vector<1x16x32xf32>
    %1 = vector.shape_cast %0 : vector<1x16x32xf32> to vector<16x32xf32>
    %c0_2 = arith.constant 0 : index
    %c0_3 = arith.constant 0 : index
    %c0_4 = arith.constant 0 : index
    %2 = vector.load %arg2[%c0_2, %c0_3, %c0_4] : memref<1x16x32xf32, #tpu.memory_space<vmem>>, vector<1x16x32xf32>
    %3 = vector.shape_cast %2 : vector<1x16x32xf32> to vector<16x32xf32>
    %4 = arith.addf %1, %3 : vector<16x32xf32>
    %c0_5 = arith.constant 0 : index
    %c0_6 = arith.constant 0 : index
    %5 = vector.load %arg3[%c0_5, %c0_6] : memref<16x16xf32, #tpu.memory_space<vmem>>, vector<16x16xf32>
    %cst = arith.constant dense<0.000000e+00> : vector<16x32xf32>
    %6 = tpu.matmul %5, %4, %cst {dimension_numbers = #tpu.dot_dimension_numbers<[1], [0], [0], [1], [0, 0, 1, 1], [], []>} : vector<16x16xf32>, vector<16x32xf32>, vector<16x32xf32> -> vector<16x32xf32>
    %7 = arith.subf %4, %6 : vector<16x32xf32>
    %c0_7 = arith.constant 0 : index
    %c0_8 = arith.constant 0 : index
    %c0_9 = arith.constant 0 : index
    %8 = vector.load %arg4[%c0_7, %c0_8, %c0_9] : memref<1x16x32xf32, #tpu.memory_space<vmem>>, vector<1x16x32xf32>
    %9 = vector.shape_cast %8 : vector<1x16x32xf32> to vector<16x32xf32>
    %10 = vector.shape_cast %7 : vector<16x32xf32> to vector<1x16x32xf32>
    tpu.vector_store %arg4[%c0_7, %c0_8, %c0_9], %10 {strides = array<i32>} : memref<1x16x32xf32, #tpu.memory_space<vmem>>, vector<1x16x32xf32>,
    return
  }
  func.func @transform_0(%arg0: i32) -> (i32, i32, i32) {
    %c0_i32 = arith.constant 0 : i32
    %c0_i32_0 = arith.constant 0 : i32
    %c0_i32_1 = arith.constant 0 : i32
    return %arg0, %c0_i32, %c0_i32_0 : i32, i32, i32
  }
  func.func @transform_1(%arg0: i32) -> (i32, i32, i32) {
    %c0_i32 = arith.constant 0 : i32
    %c0_i32_0 = arith.constant 0 : i32
    %c0_i32_1 = arith.constant 0 : i32
    return %arg0, %c0_i32, %c0_i32_0 : i32, i32, i32
  }
  func.func @transform_2(%arg0: i32) -> (i32, i32) {
    %c0_i32 = arith.constant 0 : i32
    %c0_i32_0 = arith.constant 0 : i32
    %c0_i32_1 = arith.constant 0 : i32
    return %c0_i32, %c0_i32_0 : i32, i32
  }
  func.func @transform_3(%arg0: i32) -> (i32, i32, i32) {
    %c0_i32 = arith.constant 0 : i32
    %c0_i32_0 = arith.constant 0 : i32
    %c0_i32_1 = arith.constant 0 : i32
    return %arg0, %c0_i32, %c0_i32_0 : i32, i32, i32
  }
}

module attributes {stable_mosaic.version = 11 : i64} {
  func.func @_ffn_kernel(%arg0: i32, %arg1: memref<32x32xf32, #tpu.memory_space<vmem>>, %arg2: memref<32x32xbf16, #tpu.memory_space<vmem>>, %arg3: memref<32x32xbf16, #tpu.memory_space<vmem>>, %arg4: memref<32x32xf32, #tpu.memory_space<vmem>>) attributes {dimension_semantics = [#tpu.dimension_semantics<parallel>], iteration_bounds = array<i64: 1>, scalar_prefetch = 0 : i64, scratch_operands = 0 : i64, tpu.core_type = #tpu.core_type<tc>, window_params = [{transform_indices = @transform_0, window_bounds = array<i64: 32, 32>}, {pipeline_mode = #tpu.pipeline_mode<synchronous>, transform_indices = @transform_1, window_bounds = array<i64: 32, 32>}, {pipeline_mode = #tpu.pipeline_mode<synchronous>, transform_indices = @transform_2, window_bounds = array<i64: 32, 32>}, {transform_indices = @transform_3, window_bounds = array<i64: 32, 32>}]} {
    %c0 = arith.constant 0 : index
    %c0_0 = arith.constant 0 : index
    %0 = vector.load %arg1[%c0, %c0_0] : memref<32x32xf32, #tpu.memory_space<vmem>>, vector<32x32xf32>
    %1 = arith.truncf %0 : vector<32x32xf32> to vector<32x32xbf16>
    %c0_1 = arith.constant 0 : index
    %c0_2 = arith.constant 0 : index
    %2 = vector.load %arg2[%c0_1, %c0_2] : memref<32x32xbf16, #tpu.memory_space<vmem>>, vector<32x32xbf16>
    %cst = arith.constant dense<0.000000e+00> : vector<32x32xf32>
    %3 = tpu.matmul %1, %2, %cst {dimension_numbers = #tpu.dot_dimension_numbers<[1], [0], [0], [1], [0, 0, 1, 1], [], []>} : vector<32x32xbf16>, vector<32x32xbf16>, vector<32x32xf32> -> vector<32x32xf32>
    %cst_3 = arith.constant 0.000000e+00 : f32
    %4 = vector.broadcast %cst_3 : f32 to vector<32x32xf32>
    %5 = arith.maximumf %3, %4 : vector<32x32xf32>
    %6 = arith.truncf %5 : vector<32x32xf32> to vector<32x32xbf16>
    %c0_4 = arith.constant 0 : index
    %c0_5 = arith.constant 0 : index
    %7 = vector.load %arg3[%c0_4, %c0_5] : memref<32x32xbf16, #tpu.memory_space<vmem>>, vector<32x32xbf16>
    %cst_6 = arith.constant dense<0.000000e+00> : vector<32x32xf32>
    %8 = tpu.matmul %6, %7, %cst_6 {dimension_numbers = #tpu.dot_dimension_numbers<[1], [0], [0], [1], [0, 0, 1, 1], [], []>} : vector<32x32xbf16>, vector<32x32xbf16>, vector<32x32xf32> -> vector<32x32xf32>
    %c0_7 = arith.constant 0 : index
    %c0_8 = arith.constant 0 : index
    %9 = vector.load %arg4[%c0_7, %c0_8] : memref<32x32xf32, #tpu.memory_space<vmem>>, vector<32x32xf32>
    tpu.vector_store %arg4[%c0_7, %c0_8], %8 {strides = array<i32>} : memref<32x32xf32, #tpu.memory_space<vmem>>, vector<32x32xf32>,
    return
  }
  func.func @transform_0(%arg0: i32) -> (i32, i32) {
    %c0_i32 = arith.constant 0 : i32
    %c0_i32_0 = arith.constant 0 : i32
    return %arg0, %c0_i32 : i32, i32
  }
  func.func @transform_1(%arg0: i32) -> (i32, i32) {
    %c0_i32 = arith.constant 0 : i32
    %c0_i32_0 = arith.constant 0 : i32
    %c0_i32_1 = arith.constant 0 : i32
    return %c0_i32, %c0_i32_0 : i32, i32
  }
  func.func @transform_2(%arg0: i32) -> (i32, i32) {
    %c0_i32 = arith.constant 0 : i32
    %c0_i32_0 = arith.constant 0 : i32
    %c0_i32_1 = arith.constant 0 : i32
    return %c0_i32, %c0_i32_0 : i32, i32
  }
  func.func @transform_3(%arg0: i32) -> (i32, i32) {
    %c0_i32 = arith.constant 0 : i32
    %c0_i32_0 = arith.constant 0 : i32
    return %arg0, %c0_i32 : i32, i32
  }
}

module attributes {stable_mosaic.version = 11 : i64} {
  func.func @_kv_kernel(%arg0: i32, %arg1: memref<32x32xf32, #tpu.memory_space<vmem>>, %arg2: memref<32x32xbf16, #tpu.memory_space<vmem>>, %arg3: memref<1x32xf32, #tpu.memory_space<vmem>>, %arg4: memref<32x32xbf16, #tpu.memory_space<vmem>>, %arg5: memref<1x32xf32, #tpu.memory_space<vmem>>, %arg6: memref<32x32xbf16, #tpu.memory_space<vmem>>, %arg7: memref<32x32xbf16, #tpu.memory_space<vmem>>) attributes {dimension_semantics = [#tpu.dimension_semantics<parallel>], iteration_bounds = array<i64: 1>, scalar_prefetch = 0 : i64, scratch_operands = 0 : i64, tpu.core_type = #tpu.core_type<tc>, window_params = [{transform_indices = @transform_0, window_bounds = array<i64: 32, 32>}, {pipeline_mode = #tpu.pipeline_mode<synchronous>, transform_indices = @transform_1, window_bounds = array<i64: 32, 32>}, {pipeline_mode = #tpu.pipeline_mode<synchronous>, transform_indices = @transform_2, window_bounds = array<i64: 1, 32>}, {pipeline_mode = #tpu.pipeline_mode<synchronous>, transform_indices = @transform_3, window_bounds = array<i64: 32, 32>}, {pipeline_mode = #tpu.pipeline_mode<synchronous>, transform_indices = @transform_4, window_bounds = array<i64: 1, 32>}, {transform_indices = @transform_5, window_bounds = array<i64: 32, 32>}, {transform_indices = @transform_6, window_bounds = array<i64: 32, 32>}]} {
    %c0 = arith.constant 0 : index
    %c0_0 = arith.constant 0 : index
    %0 = vector.load %arg1[%c0, %c0_0] : memref<32x32xf32, #tpu.memory_space<vmem>>, vector<32x32xf32>
    %1 = arith.truncf %0 : vector<32x32xf32> to vector<32x32xbf16>
    %c0_1 = arith.constant 0 : index
    %c0_2 = arith.constant 0 : index
    %2 = vector.load %arg2[%c0_1, %c0_2] : memref<32x32xbf16, #tpu.memory_space<vmem>>, vector<32x32xbf16>
    %cst = arith.constant dense<0.000000e+00> : vector<32x32xf32>
    %3 = tpu.matmul %1, %2, %cst {dimension_numbers = #tpu.dot_dimension_numbers<[1], [0], [0], [1], [0, 0, 1, 1], [], []>} : vector<32x32xbf16>, vector<32x32xbf16>, vector<32x32xf32> -> vector<32x32xf32>
    %c0_3 = arith.constant 0 : index
    %c0_4 = arith.constant 0 : index
    %4 = vector.load %arg3[%c0_3, %c0_4] : memref<1x32xf32, #tpu.memory_space<vmem>>, vector<1x32xf32>
    %5 = vector.broadcast %4 : vector<1x32xf32> to vector<32x32xf32>
    %6 = arith.addf %3, %5 : vector<32x32xf32>
    %7 = arith.truncf %6 : vector<32x32xf32> to vector<32x32xbf16>
    %c0_5 = arith.constant 0 : index
    %c0_6 = arith.constant 0 : index
    %8 = vector.load %arg6[%c0_5, %c0_6] : memref<32x32xbf16, #tpu.memory_space<vmem>>, vector<32x32xbf16>
    tpu.vector_store %arg6[%c0_5, %c0_6], %7 {strides = array<i32>} : memref<32x32xbf16, #tpu.memory_space<vmem>>, vector<32x32xbf16>,
    %c0_7 = arith.constant 0 : index
    %c0_8 = arith.constant 0 : index
    %9 = vector.load %arg4[%c0_7, %c0_8] : memref<32x32xbf16, #tpu.memory_space<vmem>>, vector<32x32xbf16>
    %cst_9 = arith.constant dense<0.000000e+00> : vector<32x32xf32>
    %10 = tpu.matmul %1, %9, %cst_9 {dimension_numbers = #tpu.dot_dimension_numbers<[1], [0], [0], [1], [0, 0, 1, 1], [], []>} : vector<32x32xbf16>, vector<32x32xbf16>, vector<32x32xf32> -> vector<32x32xf32>
    %c0_10 = arith.constant 0 : index
    %c0_11 = arith.constant 0 : index
    %11 = vector.load %arg5[%c0_10, %c0_11] : memref<1x32xf32, #tpu.memory_space<vmem>>, vector<1x32xf32>
    %12 = vector.broadcast %11 : vector<1x32xf32> to vector<32x32xf32>
    %13 = arith.addf %10, %12 : vector<32x32xf32>
    %14 = arith.truncf %13 : vector<32x32xf32> to vector<32x32xbf16>
    %c0_12 = arith.constant 0 : index
    %c0_13 = arith.constant 0 : index
    %15 = vector.load %arg7[%c0_12, %c0_13] : memref<32x32xbf16, #tpu.memory_space<vmem>>, vector<32x32xbf16>
    tpu.vector_store %arg7[%c0_12, %c0_13], %14 {strides = array<i32>} : memref<32x32xbf16, #tpu.memory_space<vmem>>, vector<32x32xbf16>,
    return
  }
  func.func @transform_0(%arg0: i32) -> (i32, i32) {
    %c0_i32 = arith.constant 0 : i32
    %c0_i32_0 = arith.constant 0 : i32
    return %arg0, %c0_i32 : i32, i32
  }
  func.func @transform_1(%arg0: i32) -> (i32, i32) {
    %c0_i32 = arith.constant 0 : i32
    %c0_i32_0 = arith.constant 0 : i32
    %c0_i32_1 = arith.constant 0 : i32
    return %c0_i32, %c0_i32_0 : i32, i32
  }
  func.func @transform_2(%arg0: i32) -> (i32, i32) {
    %c0_i32 = arith.constant 0 : i32
    %c0_i32_0 = arith.constant 0 : i32
    %c0_i32_1 = arith.constant 0 : i32
    return %c0_i32, %c0_i32_0 : i32, i32
  }
  func.func @transform_3(%arg0: i32) -> (i32, i32) {
    %c0_i32 = arith.constant 0 : i32
    %c0_i32_0 = arith.constant 0 : i32
    %c0_i32_1 = arith.constant 0 : i32
    return %c0_i32, %c0_i32_0 : i32, i32
  }
  func.func @transform_4(%arg0: i32) -> (i32, i32) {
    %c0_i32 = arith.constant 0 : i32
    %c0_i32_0 = arith.constant 0 : i32
    %c0_i32_1 = arith.constant 0 : i32
    return %c0_i32, %c0_i32_0 : i32, i32
  }
  func.func @transform_5(%arg0: i32) -> (i32, i32) {
    %c0_i32 = arith.constant 0 : i32
    %c0_i32_0 = arith.constant 0 : i32
    return %arg0, %c0_i32 : i32, i32
  }
  func.func @transform_6(%arg0: i32) -> (i32, i32) {
    %c0_i32 = arith.constant 0 : i32
    %c0_i32_0 = arith.constant 0 : i32
    return %arg0, %c0_i32 : i32, i32
  }
}

module attributes {stable_mosaic.version = 11 : i64} {
  func.func @_my_layernorm_kernel(%arg0: i32, %arg1: memref<1x16x32xf32, #tpu.memory_space<vmem>>, %arg2: memref<1x32xf32, #tpu.memory_space<vmem>>, %arg3: memref<1x32xf32, #tpu.memory_space<vmem>>, %arg4: memref<1x16x32xf32, #tpu.memory_space<vmem>>) attributes {dimension_semantics = [#tpu.dimension_semantics<parallel>], iteration_bounds = array<i64: 2>, scalar_prefetch = 0 : i64, scratch_operands = 0 : i64, tpu.core_type = #tpu.core_type<tc>, window_params = [{transform_indices = @transform_0, window_bounds = array<i64: 1, 16, 32>}, {pipeline_mode = #tpu.pipeline_mode<synchronous>, transform_indices = @transform_1, window_bounds = array<i64: 1, 32>}, {pipeline_mode = #tpu.pipeline_mode<synchronous>, transform_indices = @transform_2, window_bounds = array<i64: 1, 32>}, {transform_indices = @transform_3, window_bounds = array<i64: 1, 16, 32>}]} {
    %c0 = arith.constant 0 : index
    %c0_0 = arith.constant 0 : index
    %c0_1 = arith.constant 0 : index
    %0 = vector.load %arg1[%c0, %c0_0, %c0_1] : memref<1x16x32xf32, #tpu.memory_space<vmem>>, vector<1x16x32xf32>
    %1 = vector.shape_cast %0 : vector<1x16x32xf32> to vector<16x32xf32>
    %cst = arith.constant dense<0.000000e+00> : vector<16xf32>
    %2 = vector.multi_reduction <add>, %1, %cst [1] : vector<16x32xf32> to vector<16xf32>
    %3 = vector.shape_cast %2 : vector<16xf32> to vector<16x1xf32>
    %cst_2 = arith.constant 3.200000e+01 : f32
    %4 = vector.broadcast %cst_2 : f32 to vector<16x1xf32>
    %5 = arith.divf %3, %4 : vector<16x1xf32>
    %6 = vector.broadcast %5 : vector<16x1xf32> to vector<16x32xf32>
    %7 = arith.subf %1, %6 : vector<16x32xf32>
    %8 = arith.mulf %7, %7 : vector<16x32xf32>
    %cst_3 = arith.constant dense<0.000000e+00> : vector<16xf32>
    %9 = vector.multi_reduction <add>, %8, %cst_3 [1] : vector<16x32xf32> to vector<16xf32>
    %10 = vector.shape_cast %9 : vector<16xf32> to vector<16x1xf32>
    %cst_4 = arith.constant 3.200000e+01 : f32
    %11 = vector.broadcast %cst_4 : f32 to vector<16x1xf32>
    %12 = arith.divf %10, %11 : vector<16x1xf32>
    %cst_5 = arith.constant 9.99999974E-6 : f32
    %13 = vector.broadcast %cst_5 : f32 to vector<16x1xf32>
    %14 = arith.addf %12, %13 : vector<16x1xf32>
    %15 = math.rsqrt %14 : vector<16x1xf32>
    %16 = vector.broadcast %15 : vector<16x1xf32> to vector<16x32xf32>
    %17 = arith.mulf %7, %16 : vector<16x32xf32>
    %c0_6 = arith.constant 0 : index
    %c0_7 = arith.constant 0 : index
    %18 = vector.load %arg2[%c0_6, %c0_7] : memref<1x32xf32, #tpu.memory_space<vmem>>, vector<1x32xf32>
    %19 = vector.broadcast %18 : vector<1x32xf32> to vector<16x32xf32>
    %20 = arith.mulf %17, %19 : vector<16x32xf32>
    %c0_8 = arith.constant 0 : index
    %c0_9 = arith.constant 0 : index
    %21 = vector.load %arg3[%c0_8, %c0_9] : memref<1x32xf32, #tpu.memory_space<vmem>>, vector<1x32xf32>
    %22 = vector.broadcast %21 : vector<1x32xf32> to vector<16x32xf32>
    %23 = arith.addf %20, %22 : vector<16x32xf32>
    %cst_10 = arith.constant dense<0.000000e+00> : vector<32xf32>
    %24 = vector.multi_reduction <add>, %23, %cst_10 [0] : vector<16x32xf32> to vector<32xf32>
    %25 = vector.shape_cast %24 : vector<32xf32> to vector<1x32xf32>
    %cst_11 = arith.constant 1.600000e+01 : f32
    %26 = vector.broadcast %cst_11 : f32 to vector<1x32xf32>
    %27 = arith.divf %25, %26 : vector<1x32xf32>
    %28 = vector.broadcast %27 : vector<1x32xf32> to vector<16x32xf32>
    %29 = arith.subf %23, %28 : vector<16x32xf32>
    %c0_12 = arith.constant 0 : index
    %c0_13 = arith.constant 0 : index
    %c0_14 = arith.constant 0 : index
    %30 = vector.load %arg4[%c0_12, %c0_13, %c0_14] : memref<1x16x32xf32, #tpu.memory_space<vmem>>, vector<1x16x32xf32>
    %31 = vector.shape_cast %30 : vector<1x16x32xf32> to vector<16x32xf32>
    %32 = vector.shape_cast %29 : vector<16x32xf32> to vector<1x16x32xf32>
    tpu.vector_store %arg4[%c0_12, %c0_13, %c0_14], %32 {strides = array<i32>} : memref<1x16x32xf32, #tpu.memory_space<vmem>>, vector<1x16x32xf32>,
    return
  }
  func.func @transform_0(%arg0: i32) -> (i32, i32, i32) {
    %c0_i32 = arith.constant 0 : i32
    %c0_i32_0 = arith.constant 0 : i32
    %c0_i32_1 = arith.constant 0 : i32
    return %arg0, %c0_i32, %c0_i32_0 : i32, i32, i32
  }
  func.func @transform_1(%arg0: i32) -> (i32, i32) {
    %c0_i32 = arith.constant 0 : i32
    %c0_i32_0 = arith.constant 0 : i32
    %c0_i32_1 = arith.constant 0 : i32
    return %c0_i32, %c0_i32_0 : i32, i32
  }
  func.func @transform_2(%arg0: i32) -> (i32, i32) {
    %c0_i32 = arith.constant 0 : i32
    %c0_i32_0 = arith.constant 0 : i32
    %c0_i32_1 = arith.constant 0 : i32
    return %c0_i32, %c0_i32_0 : i32, i32
  }
  func.func @transform_3(%arg0: i32) -> (i32, i32, i32) {
    %c0_i32 = arith.constant 0 : i32
    %c0_i32_0 = arith.constant 0 : i32
    %c0_i32_1 = arith.constant 0 : i32
    return %arg0, %c0_i32, %c0_i32_0 : i32, i32, i32
  }
}

module attributes {stable_mosaic.version = 11 : i64} {
  func.func @_linear_kernel(%arg0: i32, %arg1: memref<32x96xf32, #tpu.memory_space<vmem>>, %arg2: memref<96x4xbf16, #tpu.memory_space<vmem>>, %arg3: memref<1x4xf32, #tpu.memory_space<vmem>>, %arg4: memref<32x4xf32, #tpu.memory_space<vmem>>) attributes {dimension_semantics = [#tpu.dimension_semantics<parallel>], iteration_bounds = array<i64: 1>, scalar_prefetch = 0 : i64, scratch_operands = 0 : i64, tpu.core_type = #tpu.core_type<tc>, window_params = [{transform_indices = @transform_0, window_bounds = array<i64: 32, 96>}, {pipeline_mode = #tpu.pipeline_mode<synchronous>, transform_indices = @transform_1, window_bounds = array<i64: 96, 4>}, {pipeline_mode = #tpu.pipeline_mode<synchronous>, transform_indices = @transform_2, window_bounds = array<i64: 1, 4>}, {transform_indices = @transform_3, window_bounds = array<i64: 32, 4>}]} {
    %c0 = arith.constant 0 : index
    %c0_0 = arith.constant 0 : index
    %0 = vector.load %arg1[%c0, %c0_0] : memref<32x96xf32, #tpu.memory_space<vmem>>, vector<32x96xf32>
    %1 = arith.truncf %0 : vector<32x96xf32> to vector<32x96xbf16>
    %c0_1 = arith.constant 0 : index
    %c0_2 = arith.constant 0 : index
    %2 = vector.load %arg2[%c0_1, %c0_2] : memref<96x4xbf16, #tpu.memory_space<vmem>>, vector<96x4xbf16>
    %cst = arith.constant dense<0.000000e+00> : vector<32x4xf32>
    %3 = tpu.matmul %1, %2, %cst {dimension_numbers = #tpu.dot_dimension_numbers<[1], [0], [0], [1], [0, 0, 1, 1], [], []>} : vector<32x96xbf16>, vector<96x4xbf16>, vector<32x4xf32> -> vector<32x4xf32>
    %c0_3 = arith.constant 0 : index
    %c0_4 = arith.constant 0 : index
    %4 = vector.load %arg3[%c0_3, %c0_4] : memref<1x4xf32, #tpu.memory_space<vmem>>, vector<1x4xf32>
    %5 = vector.broadcast %4 : vector<1x4xf32> to vector<32x4xf32>
    %6 = arith.addf %3, %5 : vector<32x4xf32>
    %c0_5 = arith.constant 0 : index
    %c0_6 = arith.constant 0 : index
    %7 = vector.load %arg4[%c0_5, %c0_6] : memref<32x4xf32, #tpu.memory_space<vmem>>, vector<32x4xf32>
    tpu.vector_store %arg4[%c0_5, %c0_6], %6 {strides = array<i32>} : memref<32x4xf32, #tpu.memory_space<vmem>>, vector<32x4xf32>,
    return
  }
  func.func @transform_0(%arg0: i32) -> (i32, i32) {
    %c0_i32 = arith.constant 0 : i32
    %c0_i32_0 = arith.constant 0 : i32
    return %arg0, %c0_i32 : i32, i32
  }
  func.func @transform_1(%arg0: i32) -> (i32, i32) {
    %c0_i32 = arith.constant 0 : i32
    %c0_i32_0 = arith.constant 0 : i32
    %c0_i32_1 = arith.constant 0 : i32
    return %c0_i32, %c0_i32_0 : i32, i32
  }
  func.func @transform_2(%arg0: i32) -> (i32, i32) {
    %c0_i32 = arith.constant 0 : i32
    %c0_i32_0 = arith.constant 0 : i32
    %c0_i32_1 = arith.constant 0 : i32
    return %c0_i32, %c0_i32_0 : i32, i32
  }
  func.func @transform_3(%arg0: i32) -> (i32, i32) {
    %c0_i32 = arith.constant 0 : i32
    %c0_i32_0 = arith.constant 0 : i32
    return %arg0, %c0_i32 : i32, i32
  }
}

module attributes {stable_mosaic.version = 11 : i64} {
  func.func @_linear_kernel(%arg0: i32, %arg1: memref<32x32xf32, #tpu.memory_space<vmem>>, %arg2: memref<32x4xbf16, #tpu.memory_space<vmem>>, %arg3: memref<1x4xf32, #tpu.memory_space<vmem>>, %arg4: memref<32x4xf32, #tpu.memory_space<vmem>>) attributes {dimension_semantics = [#tpu.dimension_semantics<parallel>], iteration_bounds = array<i64: 1>, scalar_prefetch = 0 : i64, scratch_operands = 0 : i64, tpu.core_type = #tpu.core_type<tc>, window_params = [{transform_indices = @transform_0, window_bounds = array<i64: 32, 32>}, {pipeline_mode = #tpu.pipeline_mode<synchronous>, transform_indices = @transform_1, window_bounds = array<i64: 32, 4>}, {pipeline_mode = #tpu.pipeline_mode<synchronous>, transform_indices = @transform_2, window_bounds = array<i64: 1, 4>}, {transform_indices = @transform_3, window_bounds = array<i64: 32, 4>}]} {
    %c0 = arith.constant 0 : index
    %c0_0 = arith.constant 0 : index
    %0 = vector.load %arg1[%c0, %c0_0] : memref<32x32xf32, #tpu.memory_space<vmem>>, vector<32x32xf32>
    %1 = arith.truncf %0 : vector<32x32xf32> to vector<32x32xbf16>
    %c0_1 = arith.constant 0 : index
    %c0_2 = arith.constant 0 : index
    %2 = vector.load %arg2[%c0_1, %c0_2] : memref<32x4xbf16, #tpu.memory_space<vmem>>, vector<32x4xbf16>
    %cst = arith.constant dense<0.000000e+00> : vector<32x4xf32>
    %3 = tpu.matmul %1, %2, %cst {dimension_numbers = #tpu.dot_dimension_numbers<[1], [0], [0], [1], [0, 0, 1, 1], [], []>} : vector<32x32xbf16>, vector<32x4xbf16>, vector<32x4xf32> -> vector<32x4xf32>
    %c0_3 = arith.constant 0 : index
    %c0_4 = arith.constant 0 : index
    %4 = vector.load %arg3[%c0_3, %c0_4] : memref<1x4xf32, #tpu.memory_space<vmem>>, vector<1x4xf32>
    %5 = vector.broadcast %4 : vector<1x4xf32> to vector<32x4xf32>
    %6 = arith.addf %3, %5 : vector<32x4xf32>
    %c0_5 = arith.constant 0 : index
    %c0_6 = arith.constant 0 : index
    %7 = vector.load %arg4[%c0_5, %c0_6] : memref<32x4xf32, #tpu.memory_space<vmem>>, vector<32x4xf32>
    tpu.vector_store %arg4[%c0_5, %c0_6], %6 {strides = array<i32>} : memref<32x4xf32, #tpu.memory_space<vmem>>, vector<32x4xf32>,
    return
  }
  func.func @transform_0(%arg0: i32) -> (i32, i32) {
    %c0_i32 = arith.constant 0 : i32
    %c0_i32_0 = arith.constant 0 : i32
    return %arg0, %c0_i32 : i32, i32
  }
  func.func @transform_1(%arg0: i32) -> (i32, i32) {
    %c0_i32 = arith.constant 0 : i32
    %c0_i32_0 = arith.constant 0 : i32
    %c0_i32_1 = arith.constant 0 : i32
    return %c0_i32, %c0_i32_0 : i32, i32
  }
  func.func @transform_2(%arg0: i32) -> (i32, i32) {
    %c0_i32 = arith.constant 0 : i32
    %c0_i32_0 = arith.constant 0 : i32
    %c0_i32_1 = arith.constant 0 : i32
    return %c0_i32, %c0_i32_0 : i32, i32
  }
  func.func @transform_3(%arg0: i32) -> (i32, i32) {
    %c0_i32 = arith.constant 0 : i32
    %c0_i32_0 = arith.constant 0 : i32
    return %arg0, %c0_i32 : i32, i32
  }
}

</mosaic_0001>

<bundles_post_ra>
// kernel: proformer_forward.24
= control target key start
LH: loop header
LB: loop body
LE: loop exit
PB: predicated region body
PF: predicated region fallthrough
CT: control target
= control target key end

     0   :  { %s434_s12 = smov 0   ;;  %s460_s0 = inlined_call_operand.vmem [shape: f32[2,16,4], index: 0, kind: input, shape index: {}]   ;;  %s461_s1 = inlined_call_operand.vmem [shape: f32[16,16], index: 1, kind: input, shape index: {}]   ;;  %s462_s2 = inlined_call_operand.vmem [shape: f32[2,16,4], index: 2, kind: output, shape index: {0}]   ;;  %s463_s3 = inlined_call_operand.vmem [shape: f32[2,16,4], index: 3, kind: output, shape index: {1}]  }
   0x1 LB: > { %s365_s13 = sadd.s32 4294967295, %s412_s12   ;;  %p369_p0 = scmp.ge.s32.totalorder %s412_s12, 1  ;;  %s412_s12 = sphi %s434_s12, %s14_s12  }
   0x2   : > { %p140_p1 = scmp.lt.s32.totalorder %s412_s12, 3 }
   0x4   : > { %p141_p2 = pnand %p369_p0, %p140_p1 }
   0x5   : > { %p169_p3 = scmp.lt.s32.totalorder (!%p141_p2), %s365_s13, 1  ;;  %v186_v0 = vld [vmem:[%s461_s1] sm:$0xff] (!%p141_p2)  ;;  %vm188_vm0 = vcmask (!%p141_p2), 130048   ;;  %v187_v4 = vld [vmem:[%s461_s1 + $0x8] sm:$0xff] (!%p141_p2)  ;;  %vm270_vm1 = vcmask (!%p141_p2), 31744  }
   0x6   : > { %144 = sbr.rel (%p141_p2) target bundleno = 239 (0xef), region = 28  ;;  %391 = vmatprep.mubr.msk.f32.mxu0 (!%p141_p2), %vm188_vm0, %v186_v0 }
   0xd   : > { %s465_s13 = smov (!%p169_p3, %s365_s13), 1 }
   0xe   : > { %s380_s16 = sshll.u32 %s465_s13, 4 }
   0xf   : > { %s173_s19 = scalar_lea.vmem %s460_s0, %s380_s16  ;;  %s183_s24 = scalar_lea.vmem %s463_s3, %s380_s16 }
  0x10   : > { %v184_v1 = vld [vmem:[%s173_s19] sm:$0xff]  ;;  %v185_v2 = vld [vmem:[%s173_s19 + $0x8] sm:$0xff]  ;;  %s178_s27 = scalar_lea.vmem %s462_s2, %s380_s16 }
  0x11   : > { %v394_v3 = vpack.c.bf16 %v185_v2, %v184_v1 }
  0x13   : > { %395 = vmatprep.subr.bf16.mxu0 %v394_v3 }
  0x14   : > { %397 = vmatpush3.bf16.msra.mxu0 %v394_v3 }
  0x17   : > { %392 = vmatmul.mubr.msk.f32.vlgmr.msra.gmra.mrb[0].mxu0 %vm188_vm0, %v187_v4 }
  0xea   : > { %v393_v5 = vpop.f32.mrb[0].mxu0 }
  0xeb   : > { %272 = vst.msk [vmem:[%s183_s24 + $0x8] sm:$0xff] %vm270_vm1, %v393_v5  ;;  %v274_v6 = vsub.f32 %v185_v2, %v393_v5  ;;  %v261_v7 = vpop.f32.mrb[1].mxu0 }
  0xec   : > { %271 = vst.msk [vmem:[%s183_s24] sm:$0xff] %vm270_vm1, %v261_v7  ;;  %v273_v8 = vsub.f32 %v184_v1, %v261_v7 }
  0xed   : > { %276 = vst.msk [vmem:[%s178_s27 + $0x8] sm:$0xff] %vm270_vm1, %v274_v6 }
  0xee   : > { %275 = vst.msk [vmem:[%s178_s27] sm:$0xff] %vm270_vm1, %v273_v8 }
  0xef PF: > { %s14_s12 = sadd.s32 1, %s412_s12  }
  0xf0   : > { %p11_p4 = scmp.ge.s32.totalorder %s14_s12, 4  }
  0xf2   :  { %13 = sbr.rel (!%p11_p4) target bundleno = 1 (0x1), region = 70 }

// kernel: proformer_forward.33
= control target key start
LH: loop header
LB: loop body
LE: loop exit
PB: predicated region body
PF: predicated region fallthrough
CT: control target
= control target key end

     0   :  { %vm36_vm0 = vcmask 130048   ;;  %vm92_vm1 = vcmask 261120   ;;  %s165_s1 = inlined_call_operand.vmem [shape: bf16[16,32], index: 1, kind: input, shape index: {}]   ;;  %s166_s0 = inlined_call_operand.vmem [shape: f32[32,16], index: 0, kind: input, shape index: {}]   ;;  %s167_s2 = inlined_call_operand.vmem [shape: f32[1,32], index: 2, kind: input, shape index: {}]   ;;  %s168_s3 = inlined_call_operand.vmem [shape: f32[32,32], index: 3, kind: output, shape index: {}]  }
   0x1   :  { %v114_v0 = vld [vmem:[%s165_s1] sm:$0xff]   ;;  %v16_v2 = vld [vmem:[%s166_s0 + $0x8] sm:$0xff]  ;;  %v17_v3 = vld [vmem:[%s166_s0 + $0x10] sm:$0xff] }
   0x2   :  { %v15_v1 = vld [vmem:[%s166_s0] sm:$0xff]  ;;  %108 = vmatprep.subr.bf16.mxu0 %v114_v0  ;;  %v18_v5 = vld [vmem:[%s166_s0 + $0x18] sm:$0xff] }
   0x3   :  { %v19_v4 = vpack.c.bf16 %v16_v2, %v15_v1  ;;  %109 = vmatpush3.bf16.msra.mxu0 %v114_v0  ;;  %v20_v6 = vpack.c.bf16 %v18_v5, %v17_v3  ;;  %v101_v7 = vld [vmem:[%s167_s2] ss:$0 sm:$0xff] }
   0x5   :  { %110 = vmatprep.mubr.msk.bf16.mxu0 %vm36_vm0, %v19_v4 }
   0x6   :  { %111 = vmatmul.mubr.msk.bf16.vlgmr.msra.gmra.mrb[0].mxu0 %vm36_vm0, %v20_v6 }
  0xd9   :  { %v112_v8 = vpop.f32.mrb[0].mxu0 }
  0xda   :  { %v86_v9 = vadd.f32 %v112_v8, %v101_v7  ;;  %v77_v10 = vpop.f32.mrb[1].mxu0 }
  0xdb   :  { %v78_v11 = vadd.f32 %v101_v7, %v77_v10  ;;  %v113_v12 = vpop.f32.mrb[2].mxu0 }
  0xdc   :  { %95 = vst.msk [vmem:[%s168_s3 + $0x10] sm:$0xff] %vm92_vm1, %v86_v9  ;;  %v89_v13 = vadd.f32 %v113_v12, %v101_v7  ;;  %v80_v14 = vpop.f32.mrb[3].mxu0 }
  0xdd   :  { %93 = vst.msk [vmem:[%s168_s3] sm:$0xff] %vm92_vm1, %v78_v11  ;;  %v81_v15 = vadd.f32 %v101_v7, %v80_v14 }
  0xde   :  { %96 = vst.msk [vmem:[%s168_s3 + $0x18] sm:$0xff] %vm92_vm1, %v89_v13 }
  0xdf   :  { %94 = vst.msk [vmem:[%s168_s3 + $0x8] sm:$0xff] %vm92_vm1, %v81_v15 }

// kernel: proformer_forward.34
= control target key start
LH: loop header
LB: loop body
LE: loop exit
PB: predicated region body
PF: predicated region fallthrough
CT: control target
= control target key end

     0   :  { %vm59_vm0 = vcmask 261120   ;;  %vm131_vm1 = vcmask 257024   ;;  %s556_s1 = inlined_call_operand.vmem [shape: bf16[32,32], index: 1, kind: input, shape index: {}]   ;;  %s557_s3 = inlined_call_operand.vmem [shape: bf16[32,32], index: 3, kind: input, shape index: {}]   ;;  %s558_s0 = inlined_call_operand.vmem [shape: f32[32,32], index: 0, kind: input, shape index: {}]   ;;  %s559_s5 = inlined_call_operand.vmem [shape: bf16[32,32], index: 5, kind: input, shape index: {}]   ;;  %s560_s2 = inlined_call_operand.vmem [shape: f32[1,32], index: 2, kind: input, shape index: {}]   ;;  %s561_s4 = inlined_call_operand.vmem [shape: f32[1,32], index: 4, kind: input, shape index: {}]   ;;  %s562_s7 = inlined_call_operand.vmem [shape: bf16[32,32], index: 7, kind: output, shape index: {0}]   ;;  %s563_s6 = inlined_call_operand.vmem [shape: f32[1,32], index: 6, kind: input, shape index: {}]   ;;  %s564_s8 = inlined_call_operand.vmem [shape: bf16[32,32], index: 8, kind: output, shape index: {1}]   ;;  %s565_s9 = inlined_call_operand.vmem [shape: bf16[32,32], index: 9, kind: output, shape index: {2}]  }
   0x1   :  { %v407_v0 = vld [vmem:[%s556_s1] sm:$0xff]   ;;  %v408_v1 = vld [vmem:[%s556_s1 + $0x8] sm:$0xff]   ;;  %v32_v5 = vld [vmem:[%s558_s0 + $0x10] sm:$0xff] }
   0x2   :  { %383 = vmatprep.subr.bf16.mxu0 %v407_v0  ;;  %v409_v2 = vld [vmem:[%s557_s3] sm:$0xff]   ;;  %v31_v4 = vld [vmem:[%s558_s0 + $0x8] sm:$0xff]  ;;  %v33_v7 = vld [vmem:[%s558_s0 + $0x18] sm:$0xff] }
   0x3   :  { %384 = vmatpush3.bf16.msra.mxu0 %v407_v0  ;;  %v30_v3 = vld [vmem:[%s558_s0] sm:$0xff]  ;;  %391 = vmatprep.subr.bf16.mxu1 %v409_v2  ;;  %v35_v9 = vpack.c.bf16 %v33_v7, %v32_v5  ;;  %v411_v10 = vld [vmem:[%s557_s3 + $0x8] sm:$0xff]  }
   0x4   :  { %385 = vmatprep.subr.bf16.mxu0 %v408_v1  ;;  %v34_v6 = vpack.c.bf16 %v31_v4, %v30_v3  ;;  %392 = vmatpush3.bf16.msra.mxu1 %v409_v2  ;;  %v410_v8 = vld [vmem:[%s559_s5] sm:$0xff]   ;;  %v412_v11 = vld [vmem:[%s559_s5 + $0x8] sm:$0xff]  }
   0x5   :  { %393 = vmatprep.subr.bf16.mxu1 %v411_v10  ;;  %v332_v12 = vld [vmem:[%s560_s2] ss:$0 sm:$0xff] }
   0x6   :  { %387 = vmatprep.mubr.msk.bf16.mxu0 %vm59_vm0, %v34_v6  ;;  %395 = vmatprep.mubr.msk.bf16.mxu1 %vm59_vm0, %v34_v6  ;;  %v341_v14 = vld [vmem:[%s561_s4] ss:$0 sm:$0xff] }
   0x7   :  { %386 = vmatpush3.bf16.msra.mxu0 %v408_v1  ;;  %v350_v35 = vld [vmem:[%s563_s6] ss:$0 sm:$0xff] }
   0x8   :  { %399 = vmatprep.subr.bf16.mxu0 %v410_v8  ;;  %394 = vmatpush3.bf16.msra.mxu1 %v411_v10 }
   0xa   :  { %388 = vmatmul.mubr.msk.bf16.vlgmr.msra.gmra.mrb[0].mxu0 %vm59_vm0, %v35_v9 }
   0xb   :  { %400 = vmatpush3.bf16.msra.mxu0 %v410_v8  ;;  %403 = vmatprep.mubr.msk.bf16.mxu0 %vm59_vm0, %v34_v6 }
   0xc   :  { %401 = vmatprep.subr.bf16.mxu0 %v412_v11  ;;  %396 = vmatmul.mubr.msk.bf16.vlgmr.msra.gmra.mrb[0].mxu1 %vm59_vm0, %v35_v9 }
   0xf   :  { %402 = vmatpush3.bf16.msra.mxu0 %v412_v11 }
  0x12   :  { %404 = vmatmul.mubr.msk.bf16.vlgmr.msra.gmra.mrb[4].mxu0 %vm59_vm0, %v35_v9 }
  0xdd   :  { %v389_v13 = vpop.f32.mrb[0].mxu0 }
  0xde   :  { %v109_v15 = vadd.f32 %v389_v13, %v332_v12  ;;  %v100_v16 = vpop.f32.mrb[1].mxu0 }
  0xdf   :  { %v101_v17 = vadd.f32 %v332_v12, %v100_v16  ;;  %v390_v18 = vpop.f32.mrb[2].mxu0  ;;  %v397_v19 = vpop.f32.mrb[0].mxu1 }
  0xe0   :  { %v361_v20 = vpack.c.bf16 %v109_v15, %v109_v15  ;;  %v112_v21 = vadd.f32 %v390_v18, %v332_v12  ;;  %v103_v22 = vpop.f32.mrb[3].mxu0  ;;  %v202_v23 = vadd.f32 %v397_v19, %v341_v14  ;;  %v193_v24 = vpop.f32.mrb[1].mxu1 }
  0xe1   :  { %v359_v25 = vpack.c.bf16 %v101_v17, %v101_v17  ;;  %v104_v26 = vadd.f32 %v332_v12, %v103_v22  ;;  %v194_v27 = vadd.f32 %v341_v14, %v193_v24  ;;  %v398_v28 = vpop.f32.mrb[2].mxu1 }
  0xe2   :  { %134 = vst.msk [vmem:[%s562_s7 + $0x8] sm:$0xf] %vm131_vm1, %v361_v20  ;;  %v362_v29 = vpack.c.bf16 %v112_v21, %v112_v21  ;;  %v365_v30 = vpack.c.bf16 %v202_v23, %v202_v23  ;;  %v205_v31 = vadd.f32 %v398_v28, %v341_v14  ;;  %v196_v32 = vpop.f32.mrb[3].mxu1 }
  0xe3   :  { %132 = vst.msk [vmem:[%s562_s7] sm:$0xf] %vm131_vm1, %v359_v25  ;;  %v360_v33 = vpack.c.bf16 %v104_v26, %v104_v26  ;;  %v363_v34 = vpack.c.bf16 %v194_v27, %v194_v27  ;;  %v197_v36 = vadd.f32 %v341_v14, %v196_v32 }
  0xe4   :  { %135 = vst.msk [vmem:[%s562_s7 + $0xc] sm:$0xf] %vm131_vm1, %v362_v29  ;;  %226 = vst.msk [vmem:[%s564_s8 + $0x8] sm:$0xf] %vm131_vm1, %v365_v30  ;;  %v366_v37 = vpack.c.bf16 %v205_v31, %v205_v31 }
  0xe5   :  { %133 = vst.msk [vmem:[%s562_s7 + $0x4] sm:$0xf] %vm131_vm1, %v360_v33  ;;  %224 = vst.msk [vmem:[%s564_s8] sm:$0xf] %vm131_vm1, %v363_v34  ;;  %v405_v38 = vpop.f32.mrb[4].mxu0  ;;  %v364_v39 = vpack.c.bf16 %v197_v36, %v197_v36 }
  0xe6   :  { %227 = vst.msk [vmem:[%s564_s8 + $0xc] sm:$0xf] %vm131_vm1, %v366_v37  ;;  %v294_v40 = vadd.f32 %v405_v38, %v350_v35  ;;  %v285_v41 = vpop.f32.mrb[5].mxu0 }
  0xe7   :  { %225 = vst.msk [vmem:[%s564_s8 + $0x4] sm:$0xf] %vm131_vm1, %v364_v39  ;;  %v286_v42 = vadd.f32 %v350_v35, %v285_v41  ;;  %v406_v43 = vpop.f32.mrb[6].mxu0 }
  0xe8   :  { %v369_v44 = vpack.c.bf16 %v294_v40, %v294_v40  ;;  %v297_v45 = vadd.f32 %v406_v43, %v350_v35  ;;  %v288_v46 = vpop.f32.mrb[7].mxu0 }
  0xe9   :  { %v367_v47 = vpack.c.bf16 %v286_v42, %v286_v42  ;;  %v289_v48 = vadd.f32 %v350_v35, %v288_v46 }
  0xea   :  { %318 = vst.msk [vmem:[%s565_s9 + $0x8] sm:$0xf] %vm131_vm1, %v369_v44  ;;  %v370_v49 = vpack.c.bf16 %v297_v45, %v297_v45 }
  0xeb   :  { %316 = vst.msk [vmem:[%s565_s9] sm:$0xf] %vm131_vm1, %v367_v47  ;;  %v368_v50 = vpack.c.bf16 %v289_v48, %v289_v48 }
  0xec   :  { %319 = vst.msk [vmem:[%s565_s9 + $0xc] sm:$0xf] %vm131_vm1, %v370_v49 }
  0xed   :  { %317 = vst.msk [vmem:[%s565_s9 + $0x4] sm:$0xf] %vm131_vm1, %v368_v50 }

// kernel: proformer_forward.36
= control target key start
LH: loop header
LB: loop body
LE: loop exit
PB: predicated region body
PF: predicated region fallthrough
CT: control target
= control target key end

     0   :  { %vm52_vm0 = vcmask 261120   ;;  %s192_s1 = inlined_call_operand.vmem [shape: bf16[32,32], index: 1, kind: input, shape index: {}]   ;;  %s193_s0 = inlined_call_operand.vmem [shape: bf16[32,32], index: 0, kind: input, shape index: {}]   ;;  %s194_s2 = inlined_call_operand.vmem [shape: f32[1,32], index: 2, kind: input, shape index: {}]   ;;  %s195_s3 = inlined_call_operand.vmem [shape: f32[32,32], index: 3, kind: output, shape index: {}]  }
   0x1   :  { %v135_v0 = vld [vmem:[%s192_s1] sm:$0xff]   ;;  %v136_v1 = vld [vmem:[%s192_s1 + $0x8] sm:$0xff]  }
   0x2   :  { %127 = vmatprep.subr.bf16.mxu0 %v135_v0  ;;  %v137_v2 = vld [vmem:[%s193_s0] sm:$0xff]   ;;  %v138_v3 = vld [vmem:[%s193_s0 + $0x8] sm:$0xff]  }
   0x3   :  { %128 = vmatpush3.bf16.msra.mxu0 %v135_v0  ;;  %131 = vmatprep.mubr.msk.bf16.mxu0 %vm52_vm0, %v137_v2  ;;  %v116_v4 = vld [vmem:[%s194_s2] ss:$0 sm:$0xff] }
   0x4   :  { %129 = vmatprep.subr.bf16.mxu0 %v136_v1 }
   0x7   :  { %130 = vmatpush3.bf16.msra.mxu0 %v136_v1 }
   0xa   :  { %132 = vmatmul.mubr.msk.bf16.vlgmr.msra.gmra.mrb[0].mxu0 %vm52_vm0, %v138_v3 }
  0xdd   :  { %v133_v5 = vpop.f32.mrb[0].mxu0 }
  0xde   :  { %v102_v6 = vadd.f32 %v133_v5, %v116_v4  ;;  %v93_v7 = vpop.f32.mrb[1].mxu0 }
  0xdf   :  { %v94_v8 = vadd.f32 %v116_v4, %v93_v7  ;;  %v134_v9 = vpop.f32.mrb[2].mxu0 }
  0xe0   :  { %110 = vst.msk [vmem:[%s195_s3 + $0x10] sm:$0xff] %vm52_vm0, %v102_v6  ;;  %v105_v10 = vadd.f32 %v134_v9, %v116_v4  ;;  %v96_v11 = vpop.f32.mrb[3].mxu0 }
  0xe1   :  { %108 = vst.msk [vmem:[%s195_s3] sm:$0xff] %vm52_vm0, %v94_v8  ;;  %v97_v12 = vadd.f32 %v116_v4, %v96_v11 }
  0xe2   :  { %111 = vst.msk [vmem:[%s195_s3 + $0x18] sm:$0xff] %vm52_vm0, %v105_v10 }
  0xe3   :  { %109 = vst.msk [vmem:[%s195_s3 + $0x8] sm:$0xff] %vm52_vm0, %v97_v12 }

// kernel: proformer_forward.35
= control target key start
LH: loop header
LB: loop body
LE: loop exit
PB: predicated region body
PF: predicated region fallthrough
CT: control target
= control target key end

     0   :  { %s1138_s18 = smov 0   ;;  %s1244_s0 = inlined_call_operand.vmem [shape: bf16[2,16,32], index: 0, kind: input, shape index: {}]   ;;  %s1245_s1 = inlined_call_operand.vmem [shape: bf16[2,16,32], index: 1, kind: input, shape index: {}]   ;;  %s1246_s2 = inlined_call_operand.vmem [shape: bf16[2,16,32], index: 2, kind: input, shape index: {}]   ;;  %s1247_s3 = inlined_call_operand.vmem [shape: f32[16,16], index: 3, kind: input, shape index: {}]   ;;  %s1248_s4 = inlined_call_operand.vmem [shape: f32[16,16], index: 4, kind: input, shape index: {}]   ;;  %s1249_s5 = inlined_call_operand.vmem [shape: bf16[2,16,32], index: 5, kind: output, shape index: {}]  }
   0x1 LB: > { %s960_s19 = sadd.s32 4294967295, %s1104_s18   ;;  %p964_p0 = scmp.ge.s32.totalorder %s1104_s18, 1  ;;  %s1104_s18 = sphi %s1138_s18, %s15_s18  }
   0x2   : > { %p207_p1 = scmp.lt.s32.totalorder %s1104_s18, 3 }
   0x4   : > { %p208_p2 = pnand %p964_p0, %p207_p1 }
   0x5   : > { %p245_p3 = scmp.lt.s32.totalorder (!%p208_p2), %s960_s19, 1  ;;  %v1106_v0 = vmov (!%p208_p2), 0.0   ;;  %vm1107_vm0 = vmmov (!%p208_p2), 0   ;;  %v272_v1 = vld [vmem:[%s1247_s3] sm:$0xff] (!%p208_p2)  ;;  %v1156_v2 = vld [vmem:[%s1247_s3 + $0x8] sm:$0xff] (!%p208_p2)  ;;  %vm284_vm1 = vcmask (!%p208_p2), 130048  }
   0x6   : > { %211 = sbr.rel (%p208_p2) target bundleno = 2053 (0x805), region = 40  ;;  %1013 = vmatprep.subr.bf16.mxu0 (!%p208_p2), %v1106_v0  ;;  %1019 = vmatprep.subr.bf16.mxu1 (!%p208_p2), %v1106_v0  ;;  %v1161_v3 = vld [vmem:[%s1248_s4] sm:$0xff] (!%p208_p2)  ;;  %v1166_v4 = vld [vmem:[%s1248_s4 + $0x8] sm:$0xff] (!%p208_p2)  ;;  %v276_v6 = vpack.c.bf16 (!%p208_p2), %v1156_v2, %v272_v1  ;;  %vm471_vm2 = vcmask (!%p208_p2), 261120   ;;  %vm659_vm3 = vcmask (!%p208_p2), 7168  }
   0x7   : > { %1015 = vmatprep.mubr.msk.bf16.mxu0 (!%p208_p2), %vm1107_vm0, %v1106_v0  ;;  %1021 = vmatprep.mubr.msk.bf16.mxu1 (!%p208_p2), %vm1107_vm0, %v1106_v0  ;;  %v277_v7 = vpack.c.bf16 (!%p208_p2), %v1166_v4, %v1161_v3 }
   0xd   : > { %s1251_s19 = smov (!%p245_p3, %s960_s19), 1 }
   0xe   : > { %s1151_s22 = sshll.u32 %s1251_s19, 3 }
   0xf   : > { %s249_s6 = scalar_lea.vmem %s1244_s0, %s1151_s22  ;;  %s254_s9 = scalar_lea.vmem %s1245_s1, %s1151_s22 }
  0x10   : > { %v1089_v5 = vld [vmem:[%s249_s6] sm:$0xff]   ;;  %s259_s17 = scalar_lea.vmem %s1246_s2, %s1151_s22  ;;  %s264_s29 = scalar_lea.vmem %s1249_s5, %s1151_s22 }
  0x11   : > { %1014 = vmatpush3.bf16.msra.mxu0 %v1089_v5  ;;  %1020 = vmatpush3.bf16.msra.mxu1 %v1089_v5  ;;  %v1090_v8 = vld [vmem:[%s254_s9] sm:$0xff]   ;;  %v656_v5 = vlaneseq }
  0x12   : > { %1025 = vmatprep.subr.bf16.mxu0 %v1106_v0  ;;  %1031 = vmatprep.subr.bf16.mxu1 %v1106_v0 }
  0x14   : > { %1016 = vmatmul.mubr.msk.bf16.vlgmr.msra.gmra.mrb[0].mxu0 %vm284_vm1, %v276_v6  ;;  %1022 = vmatmul.mubr.msk.bf16.vlgmr.msra.gmra.mrb[0].mxu1 %vm284_vm1, %v277_v7 }
  0x15   : > { %1026 = vmatpush3.bf16.msra.mxu0 %v1090_v8  ;;  %1032 = vmatpush3.bf16.msra.mxu1 %v1090_v8 }
  0x16   : > { %1027 = vmatprep.mubr.msk.bf16.mxu0 %vm1107_vm0, %v1106_v0  ;;  %1033 = vmatprep.mubr.msk.bf16.mxu1 %vm1107_vm0, %v1106_v0 }
  0x17   : > { %1051 = vmatprep.subr.bf16.mxu0 %v1106_v0 }
  0x1c   : > { %1028 = vmatmul.mubr.msk.bf16.vlgmr.msra.gmra.mrb[4].mxu0 %vm284_vm1, %v276_v6  ;;  %1034 = vmatmul.mubr.msk.bf16.vlgmr.msra.gmra.mrb[4].mxu1 %vm284_vm1, %v277_v7  ;;  %v1196_v6 = vshrl.u32 %v656_v5, 7 }
  0x1d   : > { %1041 = vmatprep.mubr.msk.f32.mxu1 %vm284_vm1, %v272_v1  ;;  %1053 = vmatprep.mubr.msk.bf16.mxu0 %vm1107_vm0, %v1106_v0 }
  0x1e   : > { %v1199_v7 = vadd.s32 8, %v1196_v6 }
  0xe7   : > { %v322_v9 = vpop.f32.mrb[0].mxu0  ;;  %v366_v10 = vpop.f32.mrb[0].mxu1 }
  0xe8   : > { %v1017_v11 = vpop.f32.mrb[1].mxu0  ;;  %v1023_v12 = vpop.f32.mrb[1].mxu1  ;;  %v373_v17 = vsub.f32 0.0, %v366_v10 }
  0xe9   : > { %v325_v13 = vpop.f32.mrb[2].mxu0  ;;  %v369_v14 = vpop.f32.mrb[2].mxu1 }
  0xea   : > { %v1018_v15 = vpop.f32.mrb[3].mxu0  ;;  %v1024_v16 = vpop.f32.mrb[3].mxu1  ;;  %v374_v20 = vsub.f32 0.0, %v369_v14 }
  0xef   : > { %v415_v18 = vpop.f32.mrb[4].mxu0  ;;  %v456_v19 = vpop.f32.mrb[4].mxu1 }
  0xf0   : > { %v465_v21 = vmul.f32 %v415_v18, %v322_v9  ;;  %v478_v22 = vmul.f32 %v415_v18, %v373_v17  ;;  %v463_v23 = vsub.f32 0.0, %v456_v19  ;;  %v1029_v24 = vpop.f32.mrb[5].mxu0  ;;  %v1035_v25 = vpop.f32.mrb[5].mxu1 }
  0xf1   : > { %v418_v26 = vpop.f32.mrb[6].mxu0  ;;  %v459_v27 = vpop.f32.mrb[6].mxu1 }
  0xf2   : > { %v467_v28 = vmul.f32 %v463_v23, %v373_v17  ;;  %v480_v29 = vmul.f32 %v463_v23, %v322_v9  ;;  %v466_v30 = vmul.f32 %v418_v26, %v325_v13  ;;  %v479_v31 = vmul.f32 %v418_v26, %v374_v20  ;;  %v1030_v32 = vpop.f32.mrb[7].mxu0  ;;  %v1036_v33 = vpop.f32.mrb[7].mxu1 }
  0xf3   : > { %v464_v34 = vsub.f32 0.0, %v459_v27 }
  0xf4   : > { %v482_v35 = vsub.f32 %v478_v22, %v480_v29  ;;  %v469_v36 = vadd.f32 %v467_v28, %v465_v21 }
  0xf5   : > { %v468_v37 = vmul.f32 %v464_v34, %v374_v20  ;;  %v481_v38 = vmul.f32 %v464_v34, %v325_v13 }
  0xf6   : > { %v484_v39 = vsel %vm471_vm2, %v482_v35, 0.0  ;;  %v472_v40 = vsel %vm471_vm2, %v469_v36, 0.0 }
  0xf7   : > { %485 = vadd.xlane.f32.xlu1 %v484_v39  ;;  %473 = vadd.xlane.f32.xlu0 %v472_v40  ;;  %v483_v41 = vsub.f32 %v479_v31, %v481_v38  ;;  %v470_v42 = vadd.f32 %v468_v37, %v466_v30 }
  0xf9   : > { %v487_v43 = vsel %vm471_vm2, %v483_v41, 0.0  ;;  %v475_v44 = vsel %vm471_vm2, %v470_v42, 0.0 }
  0xfb   : > { %488 = vadd.xlane.f32.xlu1 %v487_v43  ;;  %476 = vadd.xlane.f32.xlu0 %v475_v44 }
 0x184   : > { %v486_v45 = vpop.xlane.xlu1 %485  ;;  %v474_v46 = vpop.xlane.xlu0 %473 }
 0x188   : > { %v489_v47 = vpop.xlane.xlu1 %488  ;;  %v477_v48 = vpop.xlane.xlu0 %476 }
 0x189   : > { %v1057_v49 = vpack.c.bf16 %v477_v48, %v474_v46  ;;  %v1061_v50 = vpack.c.bf16 %v489_v47, %v486_v45 }
 0x18b   : > { %1058 = vmatprep.subr.bf16.mxu1 %v1057_v49 }
 0x18c   : > { %1060 = vmatpush3.bf16.msra.mxu1 %v1057_v49 }
 0x18d   : > { %1062 = vmatprep.subr.bf16.mxu1 %v1061_v50 }
 0x18f   : > { %1042 = vmatmul.mubr.msk.f32.vlgmr.msra.gmra.mrb[8].mxu1 %vm284_vm1, %v1156_v2 }
 0x190   : > { %1064 = vmatpush3.bf16.msra.mxu1 %v1061_v50  ;;  %1048 = vmatprep.mubr.msk.f32.mxu1 %vm284_vm1, %v1161_v3 }
 0x193   : > { %1049 = vmatmul.mubr.msk.f32.vlgmr.msra.gmra.mrb[10].mxu1 %vm284_vm1, %v1166_v4 }
 0x262   : > { %v1043_v51 = vpop.f32.mrb[8].mxu1 }
 0x263   : > { %v562_v52 = vpop.f32.mrb[9].mxu1 }
 0x266   : > { %v1050_v53 = vpop.f32.mrb[10].mxu1 }
 0x267   : > { %v653_v54 = vsub.f32 %v1043_v51, %v1050_v53  ;;  %v643_v55 = vpop.f32.mrb[11].mxu1 }
 0x268   : > { %v652_v56 = vsub.f32 %v562_v52, %v643_v55 }
 0x269   : > { %v655_v57 = vmul.f32 0.001953125, %v653_v54 }
 0x26a   : > { %v654_v58 = vmul.f32 0.001953125, %v652_v56 }
 0x26b   : > { %v661_v59 = vsel %vm659_vm3, %v655_v57, -inf }
 0x26c   : > { %v660_v60 = vsel %vm659_vm3, %v654_v58, -inf }
 0x26d   : > { %v662_v61 = vmax.f32 %v660_v60, %v661_v59 }
 0x26f   : > { %663 = vmax.xlane.f32.xlu0 %v662_v61 }
 0x2fc   : > { %v664_v62 = vpop.xlane.xlu0 %663 }
 0x2fd   : > { %v665_v63 = vrot.slane %v664_v62, 4 }
 0x2ff   : > { %v666_v0 = vmax.f32 %v664_v62, %v665_v63 }
 0x301   : > { %v667_v1 = vrot.slane %v666_v0, 2 }
 0x303   : > { %v668_v2 = vmax.f32 %v666_v0, %v667_v1 }
 0x305   : > { %v669_v3 = vrot.slane %v668_v2, 1 }
 0x307   : > { %v670_v4 = vmax.f32 %v668_v2, %v669_v3 }
 0x309   : > { %1065 = vpush %v670_v4  ;;  %v1091_v4 = vld [vmem:[%s259_s17] sm:$0xff]  }
 0x30a   : > { %1052 = vmatpush3.bf16.msra.mxu0 %v1091_v4 }
 0x33a   : > { %s1201_s10 = spop %1065 }
 0x33b   : > { %v672_v8 = vstv %s1201_s10  ;;  %s755_s13 = ssub.f32 %s1201_s10, %s1201_s10 }
 0x33c   : > { %vm673_vm4 = vcmp.eq.f32.partialorder %v654_v58, %v672_v8  ;;  %vm674_vm5 = vcmp.eq.f32.partialorder %v655_v57, %v672_v8 }
 0x33d   : > { %v675_v9 = vsel %vm673_vm4, %v1196_v6, 16  ;;  %v676_v10 = vsel %vm674_vm5, %v1199_v7, 16 }
 0x33e   : > { %v677_v11 = vsel %vm659_vm3, %v675_v9, 2147483647  ;;  %v678_v12 = vsel %vm659_vm3, %v676_v10, 2147483647 }
 0x33f   : > { %vm679_vm6 = vcmp.lt.s32.totalorder %v677_v11, %v678_v12 }
 0x340   : > { %v680_v13 = vsel %vm679_vm6, %v677_v11, %v678_v12 }
 0x341   : > { %v682_v14 = vshra.s32 %v680_v13, 16  ;;  %v681_v16 = vand.u32 65535, %v680_v13 }
 0x343   : > { %v684_v15 = vcvt.s32.f32 %v682_v14  ;;  %v683_v18 = vcvt.s32.f32 %v681_v16 }
 0x345   : > { %685 = vmin.xlane.f32.xlu1 %v684_v15 }
 0x3d2   : > { %v686_v17 = vpop.xlane.xlu1 %685 }
 0x3d3   : > { %vm687_vm7 = vcmp.eq.f32.partialorder %v684_v15, %v686_v17  ;;  %v692_v20 = vcvt.f32.s32 %v686_v17  ;;  %v775_v15 = vand.u32 127, %v656_v5 }
 0x3d4   : > { %v688_v19 = vsel %vm687_vm7, %v683_v18, inf }
 0x3d5   : > { %689 = vmin.xlane.f32.xlu0 %v688_v19  ;;  %v693_v22 = vshll.u32 %v692_v20, 16  ;;  %v777_v16 = vsub.s32 %v775_v15, %v1199_v7  ;;  %v776_v19 = vsub.s32 %v775_v15, %v1196_v6 }
 0x3d7   : > { %v779_v17 = vadd.s32 16, %v777_v16  ;;  %v778_v20 = vadd.s32 16, %v776_v19 }
 0x3d9   : > { %v791_v18 = vand.u32 15, %v779_v17 }
 0x3db   : > { %vm795_vm5 = vcmp.ne.s32.totalorder %v791_v18, 0  ;;  %vm797_vm6 = vcmp.lt.s32.totalorder %v791_v18, 0 }
 0x3dc   : > { %vm799_vm7 = vmand %vm797_vm6, %vm795_vm5 }
 0x462   : > { %v690_v21 = vpop.xlane.xlu0 %689 }
 0x463   : > { %v691_v23 = vcvt.f32.s32 %v690_v21  ;;  %v801_v21 = vadd.s32 16, %v791_v18 }
 0x465   : > { %v694_v24 = vadd.s32 %v693_v22, %v691_v23  ;;  %v784_v22 = vand.u32 15, %v778_v20  ;;  %v803_v23 = vsel %vm799_vm7, %v801_v21, %v791_v18 }
 0x467   : > { %v695_v25 = vrot.slane %v694_v24, 4 }
 0x469   : > { %vm696_vm8 = vcmp.lt.s32.totalorder %v694_v24, %v695_v25 }
 0x46a   : > { %v697_v26 = vsel %vm696_vm8, %v694_v24, %v695_v25 }
 0x46b   : > { %v698_v27 = vrot.slane %v697_v26, 2 }
 0x46d   : > { %vm699_vm9 = vcmp.lt.s32.totalorder %v697_v26, %v698_v27 }
 0x46e   : > { %v700_v28 = vsel %vm699_vm9, %v697_v26, %v698_v27 }
 0x46f   : > { %v701_v29 = vrot.slane %v700_v28, 1 }
 0x471   : > { %vm702_vm10 = vcmp.lt.s32.totalorder %v700_v28, %v701_v29 }
 0x472   : > { %v703_v30 = vsel %vm702_vm10, %v700_v28, %v701_v29 }
 0x473   : > { %1067 = vpush %v703_v30 }
 0x4a4   : > { %s1068_s11 = spop %1067 }
 0x4a5   : > { %v1208_v31 = vstv %s1068_s11 }
 0x4a6   : > { %vm706_vm11 = vcmp.eq.s32.totalorder %v1196_v6, %v1208_v31  ;;  %vm707_vm12 = vcmp.eq.s32.totalorder %v1199_v7, %v1208_v31  ;;  %vm804_vm9 = vcmp.eq.s32.totalorder %v784_v22, %v1208_v31  ;;  %vm805_vm10 = vcmp.eq.s32.totalorder %v803_v23, %v1208_v31 }
 0x4a7   : > { %v708_v32 = vsel %vm706_vm11, -1e+30, %v654_v58  ;;  %v709_v33 = vsel %vm707_vm12, -1e+30, %v655_v57  ;;  %v756_v57 = vstv %s755_s13  ;;  %vm878_vm12 = vcmask 257024  }
 0x4a8   : > { %v710_v34 = vsel %vm659_vm3, %v708_v32, -inf  ;;  %v711_v35 = vsel %vm659_vm3, %v709_v33, -inf  ;;  %v757_v62 = vmul.f32 1.442695, %v756_v57 }
 0x4a9   : > { %v712_v36 = vmax.f32 %v710_v34, %v711_v35 }
 0x4aa   : > { %1092 = vpow2.f32 %v757_v62 }
 0x4ab   : > { %713 = vmax.xlane.f32.xlu1 %v712_v36 }
 0x4b4   : > { %v1093_v11 = vpop.eup %1092 }
 0x538   : > { %v714_v37 = vpop.xlane.xlu1 %713 }
 0x539   : > { %v715_v38 = vrot.slane %v714_v37, 4 }
 0x53b   : > { %v716_v39 = vmax.f32 %v714_v37, %v715_v38 }
 0x53d   : > { %v717_v40 = vrot.slane %v716_v39, 2 }
 0x53f   : > { %v718_v41 = vmax.f32 %v716_v39, %v717_v40 }
 0x541   : > { %v719_v42 = vrot.slane %v718_v41, 1 }
 0x543   : > { %v720_v43 = vmax.f32 %v718_v41, %v719_v42 }
 0x545   : > { %1069 = vpush %v720_v43 }
 0x576   : > { %s1070_s12 = spop %1069 }
 0x577   : > { %v722_v44 = vstv %s1070_s12  ;;  %s760_s14 = ssub.f32 %s1070_s12, %s1201_s10 }
 0x578   : > { %vm723_vm13 = vcmp.eq.f32.partialorder %v708_v32, %v722_v44  ;;  %vm724_vm14 = vcmp.eq.f32.partialorder %v709_v33, %v722_v44 }
 0x579   : > { %v725_v45 = vsel %vm723_vm13, %v1196_v6, 16  ;;  %v726_v46 = vsel %vm724_vm14, %v1199_v7, 16  ;;  %v761_v59 = vstv %s760_s14 }
 0x57a   : > { %v727_v47 = vsel %vm659_vm3, %v725_v45, 2147483647  ;;  %v728_v48 = vsel %vm659_vm3, %v726_v46, 2147483647  ;;  %v762_v0 = vmul.f32 1.442695, %v761_v59 }
 0x57b   : > { %vm729_vm15 = vcmp.lt.s32.totalorder %v727_v47, %v728_v48 }
 0x57c   : > { %v730_v49 = vsel %vm729_vm15, %v727_v47, %v728_v48  ;;  %1094 = vpow2.f32 %v762_v0 }
 0x57d   : > { %v732_v50 = vshra.s32 %v730_v49, 16  ;;  %v731_v52 = vand.u32 65535, %v730_v49 }
 0x57f   : > { %v734_v51 = vcvt.s32.f32 %v732_v50  ;;  %v733_v54 = vcvt.s32.f32 %v731_v52 }
 0x581   : > { %735 = vmin.xlane.f32.xlu0 %v734_v51 }
 0x586   : > { %v1095_v12 = vpop.eup %1094 }
 0x60e   : > { %v736_v53 = vpop.xlane.xlu0 %735 }
 0x60f   : > { %vm737_vm0 = vcmp.eq.f32.partialorder %v734_v51, %v736_v53  ;;  %v742_v56 = vcvt.f32.s32 %v736_v53 }
 0x610   : > { %v738_v55 = vsel %vm737_vm0, %v733_v54, inf }
 0x611   : > { %739 = vmin.xlane.f32.xlu1 %v738_v55  ;;  %v743_v60 = vshll.u32 %v742_v56, 16 }
 0x69e   : > { %v740_v58 = vpop.xlane.xlu1 %739 }
 0x69f   : > { %v741_v61 = vcvt.f32.s32 %v740_v58 }
 0x6a1   : > { %v744_v63 = vadd.s32 %v743_v60, %v741_v61 }
 0x6a3   : > { %v745_v1 = vrot.slane %v744_v63, 4 }
 0x6a5   : > { %vm746_vm2 = vcmp.lt.s32.totalorder %v744_v63, %v745_v1 }
 0x6a6   : > { %v747_v2 = vsel %vm746_vm2, %v744_v63, %v745_v1 }
 0x6a7   : > { %v748_v3 = vrot.slane %v747_v2, 2 }
 0x6a9   : > { %vm749_vm3 = vcmp.lt.s32.totalorder %v747_v2, %v748_v3 }
 0x6aa   : > { %v750_v8 = vsel %vm749_vm3, %v747_v2, %v748_v3 }
 0x6ab   : > { %v751_v9 = vrot.slane %v750_v8, 1 }
 0x6ad   : > { %vm752_vm4 = vcmp.lt.s32.totalorder %v750_v8, %v751_v9 }
 0x6ae   : > { %v753_v10 = vsel %vm752_vm4, %v750_v8, %v751_v9 }
 0x6af   : > { %1071 = vpush %v753_v10 }
 0x6b0   : > { %1073 = vpush %v1093_v11 }
 0x6b1   : > { %1075 = vpush %v1095_v12 }
 0x6e0   : > { %s1072_s19 = spop %1071 }
 0x6e1   : > { %s1074_s20 = spop %1073  ;;  %v811_v24 = vstv %s1072_s19 }
 0x6e2   : > { %s1227_s21 = spop %1075  ;;  %vm812_vm8 = vcmp.eq.s32.totalorder %v784_v22, %v811_v24  ;;  %vm813_vm11 = vcmp.eq.s32.totalorder %v803_v23, %v811_v24 }
 0x6e3   : > { %s765_s23 = sadd.f32 %s1227_s21, %s1074_s20 }
 0x6e5   : > { %v766_v13 = vstv %s765_s23 }
 0x6e6   : > { %1096 = vrcp.f32 %v766_v13 }
 0x6f0   : > { %v1097_v14 = vpop.eup %1096 }
 0x6f1   : > { %1077 = vpush %v1097_v14 }
 0x722   : > { %s1078_s24 = spop %1077 }
 0x723   : > { %s769_s25 = smul.f32 %s1078_s24, %s1074_s20 }
 0x724   : > { %s773_s26 = smul.f32 %s1078_s24, %s1227_s21 }
 0x725   : > { %v806_v5 = vstv %s769_s25 }
 0x726   : > { %v807_v6 = vsel %vm804_vm9, %v806_v5, 0.0  ;;  %v808_v7 = vsel %vm805_vm10, %v806_v5, 0.0  ;;  %v814_v25 = vstv %s773_s26 }
 0x727   : > { %v815_v26 = vsel %vm812_vm8, %v814_v25, 0.0  ;;  %v816_v27 = vsel %vm813_vm11, %v814_v25, 0.0 }
 0x728   : > { %v817_v28 = vadd.f32 %v815_v26, %v807_v6  ;;  %v818_v29 = vadd.f32 %v816_v27, %v808_v7 }
 0x72a   : > { %v819_v30 = vpack.c.bf16 %v818_v29, %v817_v28 }
 0x72c   : > { %1054 = vmatmul.mubr.msk.bf16.vlgmr.msra.gmra.mrb[8].mxu0 %vm284_vm1, %v819_v30 }
 0x7ff   : > { %v863_v32 = vpop.f32.mrb[8].mxu0 }
 0x800   : > { %v993_v33 = vpack.c.bf16 %v863_v32, %v863_v32  ;;  %v1055_v31 = vpop.f32.mrb[9].mxu0 }
 0x801   : > { %v866_v34 = vpop.f32.mrb[10].mxu0 }
 0x802   : > { %879 = vst.msk [vmem:[%s264_s29] sm:$0xf] %vm878_vm12, %v993_v33  ;;  %v994_v35 = vpack.c.bf16 %v866_v34, %v866_v34  ;;  %v1056_v36 = vpop.f32.mrb[11].mxu0 }
 0x804   : > { %880 = vst.msk [vmem:[%s264_s29 + $0x4] sm:$0xf] %vm878_vm12, %v994_v35 }
 0x805 PF: > { %s15_s18 = sadd.s32 1, %s1104_s18  }
 0x806   : > { %p12_p4 = scmp.ge.s32.totalorder %s15_s18, 4  }
 0x808   :  { %14 = sbr.rel (!%p12_p4) target bundleno = 1 (0x1), region = 76 }

// kernel: proformer_forward.37
= control target key start
LH: loop header
LB: loop body
LE: loop exit
PB: predicated region body
PF: predicated region fallthrough
CT: control target
= control target key end

     0   :  { %s505_s15 = smov 0   ;;  %s536_s0 = inlined_call_operand.vmem [shape: f32[2,16,32], index: 0, kind: input, shape index: {}]   ;;  %s537_s1 = inlined_call_operand.vmem [shape: f32[2,16,32], index: 1, kind: input, shape index: {}]   ;;  %s538_s2 = inlined_call_operand.vmem [shape: f32[16,16], index: 2, kind: input, shape index: {}]   ;;  %s539_s3 = inlined_call_operand.vmem [shape: f32[2,16,32], index: 3, kind: output, shape index: {0}]   ;;  %s540_s4 = inlined_call_operand.vmem [shape: f32[2,16,32], index: 4, kind: output, shape index: {1}]  }
   0x1 LB: > { %s428_s16 = sadd.s32 4294967295, %s478_s15   ;;  %p432_p0 = scmp.ge.s32.totalorder %s478_s15, 1  ;;  %s478_s15 = sphi %s505_s15, %s15_s15  }
   0x2   : > { %p175_p1 = scmp.lt.s32.totalorder %s478_s15, 3 }
   0x4   : > { %p176_p2 = pnand %p432_p0, %p175_p1 }
   0x5   : > { %p211_p3 = scmp.lt.s32.totalorder (!%p176_p2), %s428_s16, 1  ;;  %v237_v0 = vld [vmem:[%s538_s2] sm:$0xff] (!%p176_p2)  ;;  %vm239_vm0 = vcmask (!%p176_p2), 130048   ;;  %v238_v8 = vld [vmem:[%s538_s2 + $0x8] sm:$0xff] (!%p176_p2)  ;;  %vm321_vm1 = vcmask (!%p176_p2), 261120  }
   0x6   : > { %179 = sbr.rel (%p176_p2) target bundleno = 242 (0xf2), region = 32  ;;  %457 = vmatprep.mubr.msk.f32.mxu0 (!%p176_p2), %vm239_vm0, %v237_v0 }
   0xd   : > { %s542_s16 = smov (!%p211_p3, %s428_s16), 1 }
   0xe   : > { %s445_s19 = sshll.u32 %s542_s16, 4 }
   0xf   : > { %s215_s22 = scalar_lea.vmem %s536_s0, %s445_s19  ;;  %s220_s25 = scalar_lea.vmem %s537_s1, %s445_s19 }
  0x10   : > { %v231_v1 = vld [vmem:[%s215_s22] sm:$0xff]  ;;  %v232_v2 = vld [vmem:[%s215_s22 + $0x8] sm:$0xff]  ;;  %s230_s30 = scalar_lea.vmem %s540_s4, %s445_s19  ;;  %s225_s7 = scalar_lea.vmem %s539_s3, %s445_s19 }
  0x11   : > { %v233_v3 = vld [vmem:[%s220_s25] sm:$0xff]  ;;  %v234_v4 = vld [vmem:[%s220_s25 + $0x8] sm:$0xff] }
  0x12   : > { %v235_v5 = vadd.f32 %v233_v3, %v231_v1  ;;  %v236_v6 = vadd.f32 %v234_v4, %v232_v2 }
  0x14   : > { %v460_v7 = vpack.c.bf16 %v236_v6, %v235_v5 }
  0x16   : > { %461 = vmatprep.subr.bf16.mxu0 %v460_v7 }
  0x17   : > { %463 = vmatpush3.bf16.msra.mxu0 %v460_v7 }
  0x1a   : > { %458 = vmatmul.mubr.msk.f32.vlgmr.msra.gmra.mrb[0].mxu0 %vm239_vm0, %v238_v8 }
  0xed   : > { %v459_v9 = vpop.f32.mrb[0].mxu0 }
  0xee   : > { %323 = vst.msk [vmem:[%s230_s30 + $0x8] sm:$0xff] %vm321_vm1, %v459_v9  ;;  %v325_v10 = vsub.f32 %v236_v6, %v459_v9  ;;  %v312_v11 = vpop.f32.mrb[1].mxu0 }
  0xef   : > { %322 = vst.msk [vmem:[%s230_s30] sm:$0xff] %vm321_vm1, %v312_v11  ;;  %v324_v12 = vsub.f32 %v235_v5, %v312_v11 }
  0xf0   : > { %327 = vst.msk [vmem:[%s225_s7 + $0x8] sm:$0xff] %vm321_vm1, %v325_v10 }
  0xf1   : > { %326 = vst.msk [vmem:[%s225_s7] sm:$0xff] %vm321_vm1, %v324_v12 }
  0xf2 PF: > { %s15_s15 = sadd.s32 1, %s478_s15  }
  0xf3   : > { %p12_p4 = scmp.ge.s32.totalorder %s15_s15, 4  }
  0xf5   :  { %14 = sbr.rel (!%p12_p4) target bundleno = 1 (0x1), region = 77 }

// kernel: proformer_forward.38
= control target key start
LH: loop header
LB: loop body
LE: loop exit
PB: predicated region body
PF: predicated region fallthrough
CT: control target
= control target key end

     0   :  { %vm44_vm0 = vcmask 261120   ;;  %vm116_vm1 = vcmask 257024   ;;  %s205_s1 = inlined_call_operand.vmem [shape: bf16[32,32], index: 1, kind: input, shape index: {}]   ;;  %s206_s0 = inlined_call_operand.vmem [shape: f32[32,32], index: 0, kind: input, shape index: {}]   ;;  %s207_s2 = inlined_call_operand.vmem [shape: f32[1,32], index: 2, kind: input, shape index: {}]   ;;  %s208_s3 = inlined_call_operand.vmem [shape: bf16[32,32], index: 3, kind: output, shape index: {}]  }
   0x1   :  { %v150_v0 = vld [vmem:[%s205_s1] sm:$0xff]   ;;  %v151_v1 = vld [vmem:[%s205_s1 + $0x8] sm:$0xff]   ;;  %v17_v5 = vld [vmem:[%s206_s0 + $0x10] sm:$0xff] }
   0x2   :  { %142 = vmatprep.subr.bf16.mxu0 %v150_v0  ;;  %v15_v2 = vld [vmem:[%s206_s0] sm:$0xff]  ;;  %v16_v3 = vld [vmem:[%s206_s0 + $0x8] sm:$0xff]  ;;  %v18_v6 = vld [vmem:[%s206_s0 + $0x18] sm:$0xff] }
   0x3   :  { %143 = vmatpush3.bf16.msra.mxu0 %v150_v0  ;;  %v19_v4 = vpack.c.bf16 %v16_v3, %v15_v2  ;;  %v20_v7 = vpack.c.bf16 %v18_v6, %v17_v5  ;;  %v125_v8 = vld [vmem:[%s207_s2] ss:$0 sm:$0xff] }
   0x4   :  { %144 = vmatprep.subr.bf16.mxu0 %v151_v1 }
   0x5   :  { %146 = vmatprep.mubr.msk.bf16.mxu0 %vm44_vm0, %v19_v4 }
   0x7   :  { %145 = vmatpush3.bf16.msra.mxu0 %v151_v1 }
   0xa   :  { %147 = vmatmul.mubr.msk.bf16.vlgmr.msra.gmra.mrb[0].mxu0 %vm44_vm0, %v20_v7 }
  0xdd   :  { %v148_v9 = vpop.f32.mrb[0].mxu0 }
  0xde   :  { %v94_v10 = vadd.f32 %v148_v9, %v125_v8  ;;  %v85_v11 = vpop.f32.mrb[1].mxu0 }
  0xdf   :  { %v86_v12 = vadd.f32 %v125_v8, %v85_v11  ;;  %v149_v13 = vpop.f32.mrb[2].mxu0 }
  0xe0   :  { %v136_v14 = vpack.c.bf16 %v94_v10, %v94_v10  ;;  %v97_v15 = vadd.f32 %v149_v13, %v125_v8  ;;  %v88_v16 = vpop.f32.mrb[3].mxu0 }
  0xe1   :  { %v134_v17 = vpack.c.bf16 %v86_v12, %v86_v12  ;;  %v89_v18 = vadd.f32 %v125_v8, %v88_v16 }
  0xe2   :  { %119 = vst.msk [vmem:[%s208_s3 + $0x8] sm:$0xf] %vm116_vm1, %v136_v14  ;;  %v137_v19 = vpack.c.bf16 %v97_v15, %v97_v15 }
  0xe3   :  { %117 = vst.msk [vmem:[%s208_s3] sm:$0xf] %vm116_vm1, %v134_v17  ;;  %v135_v20 = vpack.c.bf16 %v89_v18, %v89_v18 }
  0xe4   :  { %120 = vst.msk [vmem:[%s208_s3 + $0xc] sm:$0xf] %vm116_vm1, %v137_v19 }
  0xe5   :  { %118 = vst.msk [vmem:[%s208_s3 + $0x4] sm:$0xf] %vm116_vm1, %v135_v20 }

// kernel: proformer_forward.29
= control target key start
LH: loop header
LB: loop body
LE: loop exit
PB: predicated region body
PF: predicated region fallthrough
CT: control target
= control target key end

     0   :  { %s422_s12 = smov 0   ;;  %s450_s0 = inlined_call_operand.vmem [shape: f32[2,16,32], index: 0, kind: input, shape index: {}]   ;;  %s451_s1 = inlined_call_operand.vmem [shape: f32[2,16,32], index: 1, kind: input, shape index: {}]   ;;  %s452_s2 = inlined_call_operand.vmem [shape: f32[16,16], index: 2, kind: input, shape index: {}]   ;;  %s453_s3 = inlined_call_operand.vmem [shape: f32[2,16,32], index: 3, kind: output, shape index: {}]  }
   0x1 LB: > { %s353_s13 = sadd.s32 4294967295, %s400_s12   ;;  %p357_p0 = scmp.ge.s32.totalorder %s400_s12, 1  ;;  %s400_s12 = sphi %s422_s12, %s13_s12  }
   0x2   : > { %p147_p1 = scmp.lt.s32.totalorder %s400_s12, 3 }
   0x4   : > { %p148_p2 = pnand %p357_p0, %p147_p1 }
   0x5   : > { %p176_p3 = scmp.lt.s32.totalorder (!%p148_p2), %s353_s13, 1  ;;  %v197_v0 = vld [vmem:[%s452_s2] sm:$0xff] (!%p148_p2)  ;;  %vm199_vm0 = vcmask (!%p148_p2), 130048   ;;  %v198_v8 = vld [vmem:[%s452_s2 + $0x8] sm:$0xff] (!%p148_p2)  ;;  %vm283_vm1 = vcmask (!%p148_p2), 261120  }
   0x6   : > { %151 = sbr.rel (%p148_p2) target bundleno = 242 (0xf2), region = 32  ;;  %379 = vmatprep.mubr.msk.f32.mxu0 (!%p148_p2), %vm199_vm0, %v197_v0 }
   0xd   : > { %s455_s13 = smov (!%p176_p3, %s353_s13), 1 }
   0xe   : > { %s368_s16 = sshll.u32 %s455_s13, 4 }
   0xf   : > { %s180_s19 = scalar_lea.vmem %s450_s0, %s368_s16  ;;  %s185_s22 = scalar_lea.vmem %s451_s1, %s368_s16 }
  0x10   : > { %v191_v1 = vld [vmem:[%s180_s19] sm:$0xff]  ;;  %v192_v2 = vld [vmem:[%s180_s19 + $0x8] sm:$0xff]  ;;  %s190_s27 = scalar_lea.vmem %s453_s3, %s368_s16 }
  0x11   : > { %v193_v3 = vld [vmem:[%s185_s22] sm:$0xff]  ;;  %v194_v4 = vld [vmem:[%s185_s22 + $0x8] sm:$0xff] }
  0x12   : > { %v195_v5 = vadd.f32 %v193_v3, %v191_v1  ;;  %v196_v6 = vadd.f32 %v194_v4, %v192_v2 }
  0x14   : > { %v382_v7 = vpack.c.bf16 %v196_v6, %v195_v5 }
  0x16   : > { %383 = vmatprep.subr.bf16.mxu0 %v382_v7 }
  0x17   : > { %385 = vmatpush3.bf16.msra.mxu0 %v382_v7 }
  0x1a   : > { %380 = vmatmul.mubr.msk.f32.vlgmr.msra.gmra.mrb[0].mxu0 %vm199_vm0, %v198_v8 }
  0xed   : > { %v381_v9 = vpop.f32.mrb[0].mxu0 }
  0xee   : > { %v282_v10 = vsub.f32 %v196_v6, %v381_v9  ;;  %v272_v11 = vpop.f32.mrb[1].mxu0 }
  0xef   : > { %v281_v12 = vsub.f32 %v195_v5, %v272_v11 }
  0xf0   : > { %285 = vst.msk [vmem:[%s190_s27 + $0x8] sm:$0xff] %vm283_vm1, %v282_v10 }
  0xf1   : > { %284 = vst.msk [vmem:[%s190_s27] sm:$0xff] %vm283_vm1, %v281_v12 }
  0xf2 PF: > { %s13_s12 = sadd.s32 1, %s400_s12  }
  0xf3   : > { %p10_p4 = scmp.ge.s32.totalorder %s13_s12, 4  }
  0xf5   :  { %12 = sbr.rel (!%p10_p4) target bundleno = 1 (0x1), region = 65 }

// kernel: proformer_forward.30
= control target key start
LH: loop header
LB: loop body
LE: loop exit
PB: predicated region body
PF: predicated region fallthrough
CT: control target
= control target key end

     0   :  { %vm37_vm0 = vcmask 261120   ;;  %s278_s1 = inlined_call_operand.vmem [shape: bf16[32,32], index: 1, kind: input, shape index: {}]   ;;  %s279_s0 = inlined_call_operand.vmem [shape: f32[32,32], index: 0, kind: input, shape index: {}]   ;;  %s280_s2 = inlined_call_operand.vmem [shape: bf16[32,32], index: 2, kind: input, shape index: {}]   ;;  %s281_s3 = inlined_call_operand.vmem [shape: f32[32,32], index: 3, kind: output, shape index: {}]  }
   0x1   :  { %v210_v0 = vld [vmem:[%s278_s1] sm:$0xff]   ;;  %v211_v1 = vld [vmem:[%s278_s1 + $0x8] sm:$0xff]   ;;  %v17_v5 = vld [vmem:[%s279_s0 + $0x10] sm:$0xff] }
   0x2   :  { %194 = vmatprep.subr.bf16.mxu0 %v210_v0  ;;  %v15_v2 = vld [vmem:[%s279_s0] sm:$0xff]  ;;  %v16_v3 = vld [vmem:[%s279_s0 + $0x8] sm:$0xff]  ;;  %v18_v6 = vld [vmem:[%s279_s0 + $0x18] sm:$0xff] }
   0x3   :  { %195 = vmatpush3.bf16.msra.mxu0 %v210_v0  ;;  %v19_v4 = vpack.c.bf16 %v16_v3, %v15_v2  ;;  %v20_v7 = vpack.c.bf16 %v18_v6, %v17_v5  ;;  %v212_v8 = vld [vmem:[%s280_s2] sm:$0xff]   ;;  %v213_v9 = vld [vmem:[%s280_s2 + $0x8] sm:$0xff]  }
   0x4   :  { %196 = vmatprep.subr.bf16.mxu0 %v211_v1  ;;  %202 = vmatprep.subr.bf16.mxu1 %v212_v8 }
   0x5   :  { %198 = vmatprep.mubr.msk.bf16.mxu0 %vm37_vm0, %v19_v4  ;;  %203 = vmatpush3.bf16.msra.mxu1 %v212_v8 }
   0x6   :  { %204 = vmatprep.subr.bf16.mxu1 %v213_v9 }
   0x7   :  { %197 = vmatpush3.bf16.msra.mxu0 %v211_v1 }
   0x9   :  { %205 = vmatpush3.bf16.msra.mxu1 %v213_v9 }
   0xa   :  { %199 = vmatmul.mubr.msk.bf16.vlgmr.msra.gmra.mrb[0].mxu0 %vm37_vm0, %v20_v7 }
  0xdd   :  { %v200_v10 = vpop.f32.mrb[0].mxu0 }
  0xde   :  { %v78_v11 = vpop.f32.mrb[1].mxu0  ;;  %v95_v13 = vmax.f32 %v200_v10, 0.0 }
  0xdf   :  { %v201_v12 = vpop.f32.mrb[2].mxu0  ;;  %v93_v16 = vmax.f32 %v78_v11, 0.0 }
  0xe0   :  { %v96_v14 = vmax.f32 %v201_v12, 0.0  ;;  %v81_v15 = vpop.f32.mrb[3].mxu0 }
  0xe1   :  { %v94_v17 = vmax.f32 %v81_v15, 0.0 }
  0xe2   :  { %v98_v18 = vpack.c.bf16 %v96_v14, %v95_v13 }
  0xe3   :  { %v97_v19 = vpack.c.bf16 %v94_v17, %v93_v16 }
  0xe5   :  { %206 = vmatprep.mubr.msk.bf16.mxu1 %vm37_vm0, %v97_v19 }
  0xe6   :  { %207 = vmatmul.mubr.msk.bf16.vlgmr.msra.gmra.mrb[0].mxu1 %vm37_vm0, %v98_v18 }
 0x1b9   :  { %v208_v20 = vpop.f32.mrb[0].mxu1 }
 0x1ba   :  { %172 = vst.msk [vmem:[%s281_s3 + $0x10] sm:$0xff] %vm37_vm0, %v208_v20  ;;  %v155_v21 = vpop.f32.mrb[1].mxu1 }
 0x1bb   :  { %170 = vst.msk [vmem:[%s281_s3] sm:$0xff] %vm37_vm0, %v155_v21  ;;  %v209_v22 = vpop.f32.mrb[2].mxu1 }
 0x1bc   :  { %173 = vst.msk [vmem:[%s281_s3 + $0x18] sm:$0xff] %vm37_vm0, %v209_v22  ;;  %v158_v23 = vpop.f32.mrb[3].mxu1 }
 0x1bd   :  { %171 = vst.msk [vmem:[%s281_s3 + $0x8] sm:$0xff] %vm37_vm0, %v158_v23 }

// kernel: proformer_forward.32
= control target key start
LH: loop header
LB: loop body
LE: loop exit
PB: predicated region body
PF: predicated region fallthrough
CT: control target
= control target key end

     0   :  { %s344_s12 = smov 0   ;;  %s382_s0 = inlined_call_operand.vmem [shape: f32[2,16,32], index: 0, kind: input, shape index: {}]   ;;  %s383_s1 = inlined_call_operand.vmem [shape: f32[1,32], index: 1, kind: input, shape index: {}]   ;;  %s384_s2 = inlined_call_operand.vmem [shape: f32[1,32], index: 2, kind: input, shape index: {}]   ;;  %s385_s3 = inlined_call_operand.vmem [shape: f32[2,16,32], index: 3, kind: output, shape index: {}]  }
   0x1 LB: > { %s289_s13 = sadd.s32 4294967295, %s322_s12   ;;  %p293_p0 = scmp.ge.s32.totalorder %s322_s12, 1  ;;  %s322_s12 = sphi %s344_s12, %s13_s12  }
   0x2   : > { %p137_p1 = scmp.lt.s32.totalorder %s322_s12, 3 }
   0x4   : > { %p138_p2 = pnand %p293_p0, %p137_p1 }
   0x5   : > { %p161_p3 = scmp.lt.s32.totalorder (!%p138_p2), %s289_s13, 1  ;;  %vm173_vm0 = vcmask (!%p138_p2), 261120   ;;  %v298_v21 = vld [vmem:[%s383_s1] ss:$0 sm:$0xff] (!%p138_p2) }
   0x6   : > { %141 = sbr.rel (%p138_p2) target bundleno = 354 (0x162), region = 32  ;;  %v299_v25 = vld [vmem:[%s384_s2] ss:$0 sm:$0xff] (!%p138_p2) }
   0xd   : > { %s387_s13 = smov (!%p161_p3, %s289_s13), 1 }
   0xe   : > { %s302_s14 = sshll.u32 %s387_s13, 4 }
   0xf   : > { %s165_s17 = scalar_lea.vmem %s382_s0, %s302_s14  ;;  %s170_s24 = scalar_lea.vmem %s385_s3, %s302_s14 }
  0x10   : > { %v171_v0 = vld [vmem:[%s165_s17] sm:$0xff]  ;;  %v172_v1 = vld [vmem:[%s165_s17 + $0x8] sm:$0xff] }
  0x11   : > { %v174_v2 = vsel %vm173_vm0, %v171_v0, 0.0  ;;  %v177_v3 = vsel %vm173_vm0, %v172_v1, 0.0 }
  0x12   : > { %175 = vadd.xlane.f32.xlu0 %v174_v2 }
  0x16   : > { %178 = vadd.xlane.f32.xlu0 %v177_v3 }
  0x9f   : > { %v176_v4 = vpop.xlane.xlu0 %175 }
  0xa0   : > { %v181_v5 = vmul.f32 0.03125, %v176_v4 }
  0xa2   : > { %v183_v6 = vsub.f32 %v171_v0, %v181_v5 }
  0xa3   : > { %v179_v7 = vpop.xlane.xlu0 %178 }
  0xa4   : > { %v182_v8 = vmul.f32 0.03125, %v179_v7  ;;  %v185_v9 = vmul.f32 %v183_v6, %v183_v6 }
  0xa6   : > { %v184_v10 = vsub.f32 %v172_v1, %v182_v8  ;;  %v187_v11 = vsel %vm173_vm0, %v185_v9, 0.0 }
  0xa7   : > { %188 = vadd.xlane.f32.xlu1 %v187_v11 }
  0xa8   : > { %v186_v12 = vmul.f32 %v184_v10, %v184_v10 }
  0xaa   : > { %v190_v13 = vsel %vm173_vm0, %v186_v12, 0.0 }
  0xab   : > { %191 = vadd.xlane.f32.xlu1 %v190_v13 }
 0x134   : > { %v189_v14 = vpop.xlane.xlu1 %188 }
 0x135   : > { %v193_v15 = vmul.f32 0.03125, %v189_v14 }
 0x137   : > { %v195_v16 = vadd.f32 1e-05, %v193_v15 }
 0x138   : > { %v192_v17 = vpop.xlane.xlu1 %191 }
 0x139   : > { %312 = vrsqrt.f32 %v195_v16  ;;  %v194_v18 = vmul.f32 0.03125, %v192_v17 }
 0x13b   : > { %v196_v19 = vadd.f32 1e-05, %v194_v18 }
 0x13d   : > { %314 = vrsqrt.f32 %v196_v19 }
 0x143   : > { %v313_v20 = vpop.eup %312 }
 0x144   : > { %v199_v22 = vmul.f32 %v313_v20, %v183_v6 }
 0x146   : > { %v208_v23 = vmul.f32 %v298_v21, %v199_v22 }
 0x147   : > { %v315_v24 = vpop.eup %314 }
 0x148   : > { %v200_v26 = vmul.f32 %v315_v24, %v184_v10  ;;  %v217_v27 = vadd.f32 %v299_v25, %v208_v23 }
 0x14a   : > { %v209_v28 = vmul.f32 %v298_v21, %v200_v26  ;;  %v219_v30 = vsel %vm173_vm0, %v217_v27, 0.0 }
 0x14c   : > { %v218_v29 = vadd.f32 %v299_v25, %v209_v28 }
 0x14e   : > { %v220_v31 = vsel %vm173_vm0, %v218_v29, 0.0 }
 0x14f   : > { %v221_v32 = vadd.f32 %v220_v31, %v219_v30 }
 0x151   : > { %v222_v33 = vrot.slane %v221_v32, 4 }
 0x153   : > { %v223_v34 = vadd.f32 %v222_v33, %v221_v32 }
 0x155   : > { %v224_v35 = vrot.slane %v223_v34, 2 }
 0x157   : > { %v225_v36 = vadd.f32 %v224_v35, %v223_v34 }
 0x159   : > { %v226_v37 = vrot.slane %v225_v36, 1 }
 0x15b   : > { %v227_v38 = vadd.f32 %v226_v37, %v225_v36 }
 0x15d   : > { %v229_v39 = vmul.f32 0.0625, %v227_v38 }
 0x15f   : > { %v230_v40 = vsub.f32 %v217_v27, %v229_v39  ;;  %v231_v41 = vsub.f32 %v218_v29, %v229_v39 }
 0x161   : > { %232 = vst.msk [vmem:[%s170_s24] sm:$0xff] %vm173_vm0, %v230_v40  ;;  %233 = vst.msk [vmem:[%s170_s24 + $0x8] sm:$0xff] %vm173_vm0, %v231_v41 }
 0x162 PF: > { %s13_s12 = sadd.s32 1, %s322_s12  }
 0x163   : > { %p10_p4 = scmp.ge.s32.totalorder %s13_s12, 4  }
 0x165   :  { %12 = sbr.rel (!%p10_p4) target bundleno = 1 (0x1), region = 62 }

// kernel: proformer_forward.39
= control target key start
LH: loop header
LB: loop body
LE: loop exit
PB: predicated region body
PF: predicated region fallthrough
CT: control target
= control target key end

     0   :  { %vm52_vm0 = vcmask 261120   ;;  %vm124_vm1 = vcmask 257024   ;;  %s380_s1 = inlined_call_operand.vmem [shape: bf16[32,32], index: 1, kind: input, shape index: {}]   ;;  %s381_s3 = inlined_call_operand.vmem [shape: bf16[32,32], index: 3, kind: input, shape index: {}]   ;;  %s382_s0 = inlined_call_operand.vmem [shape: f32[32,32], index: 0, kind: input, shape index: {}]   ;;  %s383_s2 = inlined_call_operand.vmem [shape: f32[1,32], index: 2, kind: input, shape index: {}]   ;;  %s384_s4 = inlined_call_operand.vmem [shape: f32[1,32], index: 4, kind: input, shape index: {}]   ;;  %s385_s5 = inlined_call_operand.vmem [shape: bf16[32,32], index: 5, kind: output, shape index: {0}]   ;;  %s386_s6 = inlined_call_operand.vmem [shape: bf16[32,32], index: 6, kind: output, shape index: {1}]  }
   0x1   :  { %v279_v0 = vld [vmem:[%s380_s1] sm:$0xff]   ;;  %v281_v2 = vld [vmem:[%s380_s1 + $0x8] sm:$0xff]   ;;  %v25_v6 = vld [vmem:[%s382_s0 + $0x10] sm:$0xff] }
   0x2   :  { %v280_v1 = vld [vmem:[%s381_s3] sm:$0xff]   ;;  %263 = vmatprep.subr.bf16.mxu0 %v279_v0  ;;  %v282_v3 = vld [vmem:[%s381_s3 + $0x8] sm:$0xff]   ;;  %v26_v8 = vld [vmem:[%s382_s0 + $0x18] sm:$0xff] }
   0x3   :  { %271 = vmatprep.subr.bf16.mxu1 %v280_v1  ;;  %264 = vmatpush3.bf16.msra.mxu0 %v279_v0  ;;  %v23_v4 = vld [vmem:[%s382_s0] sm:$0xff]  ;;  %v24_v5 = vld [vmem:[%s382_s0 + $0x8] sm:$0xff]  ;;  %v28_v9 = vpack.c.bf16 %v26_v8, %v25_v6 }
   0x4   :  { %272 = vmatpush3.bf16.msra.mxu1 %v280_v1  ;;  %265 = vmatprep.subr.bf16.mxu0 %v281_v2  ;;  %v27_v7 = vpack.c.bf16 %v24_v5, %v23_v4  ;;  %v229_v10 = vld [vmem:[%s383_s2] ss:$0 sm:$0xff] }
   0x5   :  { %273 = vmatprep.subr.bf16.mxu1 %v282_v3  ;;  %v238_v11 = vld [vmem:[%s384_s4] ss:$0 sm:$0xff] }
   0x6   :  { %267 = vmatprep.mubr.msk.bf16.mxu0 %vm52_vm0, %v27_v7  ;;  %275 = vmatprep.mubr.msk.bf16.mxu1 %vm52_vm0, %v27_v7 }
   0x7   :  { %266 = vmatpush3.bf16.msra.mxu0 %v281_v2 }
   0x8   :  { %274 = vmatpush3.bf16.msra.mxu1 %v282_v3 }
   0xa   :  { %268 = vmatmul.mubr.msk.bf16.vlgmr.msra.gmra.mrb[0].mxu0 %vm52_vm0, %v28_v9 }
   0xb   :  { %276 = vmatmul.mubr.msk.bf16.vlgmr.msra.gmra.mrb[0].mxu1 %vm52_vm0, %v28_v9 }
  0xdd   :  { %v269_v12 = vpop.f32.mrb[0].mxu0 }
  0xde   :  { %v102_v13 = vadd.f32 %v269_v12, %v229_v10  ;;  %v277_v14 = vpop.f32.mrb[0].mxu1  ;;  %v93_v15 = vpop.f32.mrb[1].mxu0 }
  0xdf   :  { %v195_v16 = vadd.f32 %v277_v14, %v238_v11  ;;  %v94_v17 = vadd.f32 %v229_v10, %v93_v15  ;;  %v186_v18 = vpop.f32.mrb[1].mxu1  ;;  %v270_v19 = vpop.f32.mrb[2].mxu0 }
  0xe0   :  { %v249_v20 = vpack.c.bf16 %v102_v13, %v102_v13  ;;  %v187_v21 = vadd.f32 %v238_v11, %v186_v18  ;;  %v105_v22 = vadd.f32 %v270_v19, %v229_v10  ;;  %v278_v23 = vpop.f32.mrb[2].mxu1  ;;  %v96_v24 = vpop.f32.mrb[3].mxu0 }
  0xe1   :  { %v253_v25 = vpack.c.bf16 %v195_v16, %v195_v16  ;;  %v247_v26 = vpack.c.bf16 %v94_v17, %v94_v17  ;;  %v198_v27 = vadd.f32 %v278_v23, %v238_v11  ;;  %v97_v28 = vadd.f32 %v229_v10, %v96_v24  ;;  %v189_v29 = vpop.f32.mrb[3].mxu1 }
  0xe2   :  { %127 = vst.msk [vmem:[%s385_s5 + $0x8] sm:$0xf] %vm124_vm1, %v249_v20  ;;  %v251_v30 = vpack.c.bf16 %v187_v21, %v187_v21  ;;  %v250_v31 = vpack.c.bf16 %v105_v22, %v105_v22  ;;  %v190_v32 = vadd.f32 %v238_v11, %v189_v29 }
  0xe3   :  { %219 = vst.msk [vmem:[%s386_s6 + $0x8] sm:$0xf] %vm124_vm1, %v253_v25  ;;  %125 = vst.msk [vmem:[%s385_s5] sm:$0xf] %vm124_vm1, %v247_v26  ;;  %v254_v33 = vpack.c.bf16 %v198_v27, %v198_v27  ;;  %v248_v34 = vpack.c.bf16 %v97_v28, %v97_v28 }
  0xe4   :  { %217 = vst.msk [vmem:[%s386_s6] sm:$0xf] %vm124_vm1, %v251_v30  ;;  %128 = vst.msk [vmem:[%s385_s5 + $0xc] sm:$0xf] %vm124_vm1, %v250_v31  ;;  %v252_v35 = vpack.c.bf16 %v190_v32, %v190_v32 }
  0xe5   :  { %220 = vst.msk [vmem:[%s386_s6 + $0xc] sm:$0xf] %vm124_vm1, %v254_v33  ;;  %126 = vst.msk [vmem:[%s385_s5 + $0x4] sm:$0xf] %vm124_vm1, %v248_v34 }
  0xe6   :  { %218 = vst.msk [vmem:[%s386_s6 + $0x4] sm:$0xf] %vm124_vm1, %v252_v35 }

// kernel: proformer_forward.45
= control target key start
LH: loop header
LB: loop body
LE: loop exit
PB: predicated region body
PF: predicated region fallthrough
CT: control target
= control target key end

     0   :  { %vm76_vm0 = vcmask 785408   ;;  %vm132_vm1 = vcmask 31744   ;;  %s247_s1 = inlined_call_operand.vmem [shape: bf16[96,4], index: 1, kind: input, shape index: {}]   ;;  %s248_s0 = inlined_call_operand.vmem [shape: f32[32,96], index: 0, kind: input, shape index: {}]   ;;  %s249_s2 = inlined_call_operand.vmem [shape: f32[1,4], index: 2, kind: input, shape index: {}]   ;;  %s250_s3 = inlined_call_operand.vmem [shape: f32[32,4], index: 3, kind: output, shape index: {}]  }
   0x1   :  { %v174_v0 = vld [vmem:[%s247_s1] sm:$0xff]   ;;  %v175_v1 = vld [vmem:[%s247_s1 + $0x8] sm:$0xff]   ;;  %v176_v2 = vld [vmem:[%s247_s1 + $0x10] sm:$0xff]  }
   0x2   :  { %158 = vmatprep.subr.bf16.mxu0 %v174_v0  ;;  %v15_v3 = vld [vmem:[%s248_s0] sm:$0xff]  ;;  %v16_v4 = vld [vmem:[%s248_s0 + $0x8] sm:$0xff]  ;;  %v177_v6 = vld [vmem:[%s247_s1 + $0x18] sm:$0xff]  }
   0x3   :  { %159 = vmatpush3.bf16.msra.mxu0 %v174_v0  ;;  %v19_v5 = vpack.c.bf16 %v16_v4, %v15_v3  ;;  %v178_v7 = vld [vmem:[%s247_s1 + $0x20] sm:$0xff]   ;;  %v179_v8 = vld [vmem:[%s247_s1 + $0x28] sm:$0xff]   ;;  %v17_v9 = vld [vmem:[%s248_s0 + $0x10] sm:$0xff] }
   0x4   :  { %160 = vmatprep.subr.bf16.mxu0 %v175_v1  ;;  %v18_v10 = vld [vmem:[%s248_s0 + $0x18] sm:$0xff]  ;;  %v141_v12 = vld [vmem:[%s249_s2] ss:$0 sm:$0xff] }
   0x5   :  { %170 = vmatprep.mubr.msk.bf16.mxu0 %vm76_vm0, %v19_v5  ;;  %v20_v11 = vpack.c.bf16 %v18_v10, %v17_v9 }
   0x7   :  { %161 = vmatpush3.bf16.msra.mxu0 %v175_v1 }
   0x8   :  { %162 = vmatprep.subr.bf16.mxu0 %v176_v2 }
   0xb   :  { %163 = vmatpush3.bf16.msra.mxu0 %v176_v2 }
   0xc   :  { %164 = vmatprep.subr.bf16.mxu0 %v177_v6 }
   0xf   :  { %165 = vmatpush3.bf16.msra.mxu0 %v177_v6 }
  0x10   :  { %166 = vmatprep.subr.bf16.mxu0 %v178_v7 }
  0x13   :  { %167 = vmatpush3.bf16.msra.mxu0 %v178_v7 }
  0x14   :  { %168 = vmatprep.subr.bf16.mxu0 %v179_v8 }
  0x17   :  { %169 = vmatpush3.bf16.msra.mxu0 %v179_v8 }
  0x1a   :  { %171 = vmatmul.mubr.msk.bf16.vlgmr.msra.gmra.mrb[0].mxu0 %vm76_vm0, %v20_v11 }
  0xed   :  { %v172_v13 = vpop.f32.mrb[0].mxu0 }
  0xee   :  { %v126_v14 = vadd.f32 %v172_v13, %v141_v12  ;;  %v117_v15 = vpop.f32.mrb[1].mxu0 }
  0xef   :  { %v118_v16 = vadd.f32 %v141_v12, %v117_v15  ;;  %v173_v17 = vpop.f32.mrb[2].mxu0 }
  0xf0   :  { %135 = vst.msk [vmem:[%s250_s3 + $0x10] sm:$0xff] %vm132_vm1, %v126_v14  ;;  %v129_v18 = vadd.f32 %v173_v17, %v141_v12  ;;  %v120_v19 = vpop.f32.mrb[3].mxu0 }
  0xf1   :  { %133 = vst.msk [vmem:[%s250_s3] sm:$0xff] %vm132_vm1, %v118_v16  ;;  %v121_v20 = vadd.f32 %v141_v12, %v120_v19 }
  0xf2   :  { %136 = vst.msk [vmem:[%s250_s3 + $0x18] sm:$0xff] %vm132_vm1, %v129_v18 }
  0xf3   :  { %134 = vst.msk [vmem:[%s250_s3 + $0x8] sm:$0xff] %vm132_vm1, %v121_v20 }

// kernel: proformer_forward.47
= control target key start
LH: loop header
LB: loop body
LE: loop exit
PB: predicated region body
PF: predicated region fallthrough
CT: control target
= control target key end

     0   :  { %vm44_vm0 = vcmask 261120   ;;  %vm100_vm1 = vcmask 31744   ;;  %s181_s1 = inlined_call_operand.vmem [shape: bf16[32,4], index: 1, kind: input, shape index: {}]   ;;  %s182_s0 = inlined_call_operand.vmem [shape: f32[32,32], index: 0, kind: input, shape index: {}]   ;;  %s183_s2 = inlined_call_operand.vmem [shape: f32[1,4], index: 2, kind: input, shape index: {}]   ;;  %s184_s3 = inlined_call_operand.vmem [shape: f32[32,4], index: 3, kind: output, shape index: {}]  }
   0x1   :  { %v126_v0 = vld [vmem:[%s181_s1] sm:$0xff]   ;;  %v127_v1 = vld [vmem:[%s181_s1 + $0x8] sm:$0xff]   ;;  %v17_v5 = vld [vmem:[%s182_s0 + $0x10] sm:$0xff] }
   0x2   :  { %118 = vmatprep.subr.bf16.mxu0 %v126_v0  ;;  %v15_v2 = vld [vmem:[%s182_s0] sm:$0xff]  ;;  %v16_v3 = vld [vmem:[%s182_s0 + $0x8] sm:$0xff]  ;;  %v18_v6 = vld [vmem:[%s182_s0 + $0x18] sm:$0xff] }
   0x3   :  { %119 = vmatpush3.bf16.msra.mxu0 %v126_v0  ;;  %v19_v4 = vpack.c.bf16 %v16_v3, %v15_v2  ;;  %v20_v7 = vpack.c.bf16 %v18_v6, %v17_v5  ;;  %v109_v8 = vld [vmem:[%s183_s2] ss:$0 sm:$0xff] }
   0x4   :  { %120 = vmatprep.subr.bf16.mxu0 %v127_v1 }
   0x5   :  { %122 = vmatprep.mubr.msk.bf16.mxu0 %vm44_vm0, %v19_v4 }
   0x7   :  { %121 = vmatpush3.bf16.msra.mxu0 %v127_v1 }
   0xa   :  { %123 = vmatmul.mubr.msk.bf16.vlgmr.msra.gmra.mrb[0].mxu0 %vm44_vm0, %v20_v7 }
  0xdd   :  { %v124_v9 = vpop.f32.mrb[0].mxu0 }
  0xde   :  { %v94_v10 = vadd.f32 %v124_v9, %v109_v8  ;;  %v85_v11 = vpop.f32.mrb[1].mxu0 }
  0xdf   :  { %v86_v12 = vadd.f32 %v109_v8, %v85_v11  ;;  %v125_v13 = vpop.f32.mrb[2].mxu0 }
  0xe0   :  { %103 = vst.msk [vmem:[%s184_s3 + $0x10] sm:$0xff] %vm100_vm1, %v94_v10  ;;  %v97_v14 = vadd.f32 %v125_v13, %v109_v8  ;;  %v88_v15 = vpop.f32.mrb[3].mxu0 }
  0xe1   :  { %101 = vst.msk [vmem:[%s184_s3] sm:$0xff] %vm100_vm1, %v86_v12  ;;  %v89_v16 = vadd.f32 %v109_v8, %v88_v15 }
  0xe2   :  { %104 = vst.msk [vmem:[%s184_s3 + $0x18] sm:$0xff] %vm100_vm1, %v97_v14 }
  0xe3   :  { %102 = vst.msk [vmem:[%s184_s3 + $0x8] sm:$0xff] %vm100_vm1, %v89_v16 }

</bundles_post_ra>
